<compile_context>
chip_gen: v6e
topology: v6e:2x2x1
jax: 0.10.0
libtpu: 0.0.40
codegen_flags: <defaults>
</compile_context>

<pallas_src>
import jax
import jax.numpy as jnp
from jax import lax
from jax.experimental import pallas as pl
from jax.experimental.pallas import tpu as pltpu


K_IN, H1, H2, N_OUT = 300, 256, 256, 4
N_PAD = 128          # 4 -> 128: lane-dense output store
NEG_BIG = -1e30      # bias on padded logit columns -> exp() underflows to exactly 0 (f32 epilogue)
STRIP = 128          # rows per in-kernel strip (bounds h1/h2 live ranges for big tiles)


def _round_up(v, m):
    return -(-v // m) * m


def _make_kernel(n_strips, strip):
    """Kernel closure over the (static) strip structure of one batch tile."""

    def kernel(x_ref, w1_ref, b1_ref, w2_ref, b2_ref, w3_ref, b3_ref, o_ref):
        def compute(x_f32):
            # bf16 cast in-kernel (VPU is idle); matmuls accumulate in f32 on the MXU.
            x = x_f32.astype(jnp.bfloat16)                                   # (rows, 300)
            h1 = jnp.dot(x, w1_ref[...], preferred_element_type=jnp.float32) + b1_ref[...]
            h1 = jnp.maximum(h1, 0.0)
            h2 = jnp.dot(h1.astype(jnp.bfloat16), w2_ref[...],
                         preferred_element_type=jnp.float32) + b2_ref[...]
            h2 = jnp.maximum(h2, 0.0)
            logits = jnp.dot(h2.astype(jnp.bfloat16), w3_ref[...],
                             preferred_element_type=jnp.float32) + b3_ref[...]  # (rows, 128)
            # Numerically stable softmax over the padded feature axis.
            # Padded columns carry a -1e30 bias, so exp() underflows to exactly 0 and the
            # softmax over 128 columns equals the softmax over the 4 real logits.
            m = jnp.max(logits, axis=1, keepdims=True)
            e = jnp.exp(logits - m)
            denom = jnp.sum(e, axis=1, keepdims=True)
            return (e / denom).astype(o_ref.dtype)          # exact divide -> rows sum to 1

        if n_strips == 1:
            o_ref[...] = compute(x_ref[...])
        else:
            def strip_body(s, carry):
                row0 = pl.multiple_of(s * strip, strip)
                rows = pl.ds(row0, strip)
                o_ref[rows, :] = compute(x_ref[rows, :])
                return carry

            lax.fori_loop(0, n_strips, strip_body, 0, unroll=True)

    return kernel


def prepare_params(w1, b1, w2, b2, w3, b3):
    """One-time weight prep (hoisted out of the forward path).

    Weights are stored transposed vs PyTorch, i.e. (in_features, out_features), cast to
    bf16; the last layer is padded to N_PAD output lanes with zero weights and a -1e30
    bias so the in-kernel padded softmax is exact.
    """
    w1_p = w1.astype(jnp.bfloat16)                                           # (300, 256)
    w2_p = w2.astype(jnp.bfloat16)                                           # (256, 256)
    w3_p = jnp.zeros((H2, N_PAD), jnp.bfloat16).at[:, :N_OUT].set(w3.astype(jnp.bfloat16))
    b1_p = b1.reshape(1, H1).astype(jnp.float32)
    b2_p = b2.reshape(1, H2).astype(jnp.float32)
    b3_p = jnp.full((1, N_PAD), NEG_BIG, jnp.float32).at[:, :N_OUT].set(
        b3.reshape(1, N_OUT).astype(jnp.float32))
    return w1_p, b1_p, w2_p, b2_p, w3_p, b3_p


def mlp_softmax(x, params, *, tb=512):
    """x: (B, 300) f32; params: output of prepare_params(). Returns (B, 4) f32 softmax."""
    w1_p, b1_p, w2_p, b2_p, w3_p, b3_p = params
    B = x.shape[0]

    # Batch tile: multiple of 8 sublanes; keep >= 2 grid steps when B allows (v7x
    # megacore); multiple of STRIP when strip-mined.  Ragged last tiles are allowed
    # (masked output writes), so no batch padding is materialized.
    two_tile = _round_up(max(1, -(-B // 2)), 8)
    tb = max(8, min(int(tb), two_tile))
    if tb > STRIP:
        tb = _round_up(tb, STRIP)
        strip = STRIP
    else:
        strip = tb
    n_strips = tb // strip
    n_tiles = pl.cdiv(B, tb)

    # Scoped-VMEM estimate: double-buffered x/out blocks + resident bf16 weights + strip
    # scratch headroom.  Only pass an explicit limit when a huge user-chosen tb needs it
    # (v5e scoped default is 16 MiB; v6e/v7x default 32 MiB).
    weight_bytes = 2 * 2 * (K_IN * H1 + H1 * H2 + H2 * N_PAD) + 2 * 4 * (H1 + H2 + N_PAD)
    vmem_bytes = (2 * tb * K_IN * 4            # x blocks (f32, double-buffered)
                  + 2 * tb * N_PAD * 4         # out blocks (f32, double-buffered)
                  + weight_bytes
                  + 4 * strip * (H1 + H2) * 4)  # h1/h2 live values / spill scratch
    cp_kwargs = dict(dimension_semantics=("parallel",))
    if vmem_bytes > 24 * 1024 * 1024:
        cp_kwargs["vmem_limit_bytes"] = int(vmem_bytes)

    out = pl.pallas_call(
        _make_kernel(n_strips, strip),
        out_shape=jax.ShapeDtypeStruct((B, N_PAD), jnp.float32),
        grid=(n_tiles,),
        in_specs=[
            pl.BlockSpec((tb, K_IN), lambda i: (i, 0)),      # x tile: unpadded f32, 300 lanes
            pl.BlockSpec((K_IN, H1), lambda i: (0, 0)),      # weights/biases: VMEM-resident
            pl.BlockSpec((1, H1), lambda i: (0, 0)),
            pl.BlockSpec((H1, H2), lambda i: (0, 0)),
            pl.BlockSpec((1, H2), lambda i: (0, 0)),
            pl.BlockSpec((H2, N_PAD), lambda i: (0, 0)),
            pl.BlockSpec((1, N_PAD), lambda i: (0, 0)),
        ],
        out_specs=pl.BlockSpec((tb, N_PAD), lambda i: (i, 0)),
        compiler_params=pltpu.CompilerParams(**cp_kwargs),
    )(x, w1_p, b1_p, w2_p, b2_p, w3_p, b3_p)
    return out[:, :N_OUT]


def init_params(key):
    # Deterministic init mimicking nn.Linear's uniform(-1/sqrt(fan_in), 1/sqrt(fan_in)).
    dims = [(K_IN, H1), (H1, H2), (H2, N_OUT)]
    params = []
    for fan_in, fan_out in dims:
        key, kw, kb = jax.random.split(key, 3)
        bound = 1.0 / jnp.sqrt(fan_in)
        w = jax.random.uniform(kw, (fan_in, fan_out), jnp.float32, -bound, bound)
        b = jax.random.uniform(kb, (1, fan_out), jnp.float32, -bound, bound)
        params += [w, b]
    return params


def reference_bf16(x, w1, b1, w2, b2, w3, b3):
    # Same numerics as the kernel (bf16 matmul inputs, f32 accumulation / epilogue).
    xb = x.astype(jnp.bfloat16)
    h1 = jnp.maximum(jnp.dot(xb, w1.astype(jnp.bfloat16),
                             preferred_element_type=jnp.float32) + b1, 0.0)
    h2 = jnp.maximum(jnp.dot(h1.astype(jnp.bfloat16), w2.astype(jnp.bfloat16),
                             preferred_element_type=jnp.float32) + b2, 0.0)
    logits = jnp.dot(h2.astype(jnp.bfloat16), w3.astype(jnp.bfloat16),
                     preferred_element_type=jnp.float32) + b3
    return jax.nn.softmax(logits, axis=1)


def reference_f32(x, w1, b1, w2, b2, w3, b3):
    # Plain f32 math, PyTorch forward semantics.
    h1 = jnp.maximum(x @ w1 + b1, 0.0)
    h2 = jnp.maximum(h1 @ w2 + b2, 0.0)
    return jax.nn.softmax(h2 @ w3 + b3, axis=1)


if __name__ == "__main__":
    key = jax.random.PRNGKey(0)
    key, kx = jax.random.split(key)
    B = 256  # -> two 128-row tiles: exercises the batched grid / "parallel" batch axis
    x = jax.random.normal(kx, (B, K_IN), jnp.float32)
    w1, b1, w2, b2, w3, b3 = init_params(key)
    params = prepare_params(w1, b1, w2, b2, w3, b3)   # one-time, outside the forward path

    out = mlp_softmax(x, params)
    out = jax.block_until_ready(out)
    assert out.shape == (B, N_OUT)

    ref_bf = reference_bf16(x, w1, b1, w2, b2, w3, b3)
    ref_f32 = reference_f32(x, w1, b1, w2, b2, w3, b3)
    # Tight check vs a reference with identical matmul numerics.
    assert jnp.allclose(out, ref_bf, atol=2e-3, rtol=2e-2)
    # Looser sanity check vs the f32 (PyTorch-semantics) reference.
    assert jnp.allclose(out, ref_f32, atol=3e-2)
    # Rows are valid probability distributions (exact divide -> f32-rounding accurate).
    assert jnp.allclose(jnp.sum(out, axis=1), jnp.ones((B,)), atol=1e-3)

    print("KERNEL_OK")
</pallas_src>

<mosaic_0001>
module attributes {stable_mosaic.version = 11 : i64} {
  func.func @kernel(%arg0: i32, %arg1: memref<128x300xf32, #tpu.memory_space<vmem>>, %arg2: memref<300x256xbf16, #tpu.memory_space<vmem>>, %arg3: memref<1x256xf32, #tpu.memory_space<vmem>>, %arg4: memref<256x256xbf16, #tpu.memory_space<vmem>>, %arg5: memref<1x256xf32, #tpu.memory_space<vmem>>, %arg6: memref<256x128xbf16, #tpu.memory_space<vmem>>, %arg7: memref<1x128xf32, #tpu.memory_space<vmem>>, %arg8: memref<128x128xf32, #tpu.memory_space<vmem>>) attributes {dimension_semantics = [#tpu.dimension_semantics<parallel>], iteration_bounds = array<i64: 2>, scalar_prefetch = 0 : i64, scratch_operands = 0 : i64, tpu.core_type = #tpu.core_type<tc>, window_params = [{transform_indices = @transform_0, window_bounds = array<i64: 128, 300>}, {pipeline_mode = #tpu.pipeline_mode<synchronous>, transform_indices = @transform_1, window_bounds = array<i64: 300, 256>}, {pipeline_mode = #tpu.pipeline_mode<synchronous>, transform_indices = @transform_2, window_bounds = array<i64: 1, 256>}, {pipeline_mode = #tpu.pipeline_mode<synchronous>, transform_indices = @transform_3, window_bounds = array<i64: 256, 256>}, {pipeline_mode = #tpu.pipeline_mode<synchronous>, transform_indices = @transform_4, window_bounds = array<i64: 1, 256>}, {pipeline_mode = #tpu.pipeline_mode<synchronous>, transform_indices = @transform_5, window_bounds = array<i64: 256, 128>}, {pipeline_mode = #tpu.pipeline_mode<synchronous>, transform_indices = @transform_6, window_bounds = array<i64: 1, 128>}, {transform_indices = @transform_7, window_bounds = array<i64: 128, 128>}]} {
    %c0 = arith.constant 0 : index
    %c0_0 = arith.constant 0 : index
    %0 = vector.load %arg1[%c0, %c0_0] : memref<128x300xf32, #tpu.memory_space<vmem>>, vector<128x300xf32>
    %1 = arith.truncf %0 : vector<128x300xf32> to vector<128x300xbf16>
    %c0_1 = arith.constant 0 : index
    %c0_2 = arith.constant 0 : index
    %2 = vector.load %arg2[%c0_1, %c0_2] : memref<300x256xbf16, #tpu.memory_space<vmem>>, vector<300x256xbf16>
    %cst = arith.constant dense<0.000000e+00> : vector<128x256xf32>
    %3 = tpu.matmul %1, %2, %cst {dimension_numbers = #tpu.dot_dimension_numbers<[1], [0], [0], [1], [0, 0, 1, 1], [], []>} : vector<128x300xbf16>, vector<300x256xbf16>, vector<128x256xf32> -> vector<128x256xf32>
    %c0_3 = arith.constant 0 : index
    %c0_4 = arith.constant 0 : index
    %4 = vector.load %arg3[%c0_3, %c0_4] : memref<1x256xf32, #tpu.memory_space<vmem>>, vector<1x256xf32>
    %5 = vector.broadcast %4 : vector<1x256xf32> to vector<128x256xf32>
    %6 = arith.addf %3, %5 : vector<128x256xf32>
    %cst_5 = arith.constant 0.000000e+00 : f32
    %7 = vector.broadcast %cst_5 : f32 to vector<128x256xf32>
    %8 = arith.maximumf %6, %7 : vector<128x256xf32>
    %9 = arith.truncf %8 : vector<128x256xf32> to vector<128x256xbf16>
    %c0_6 = arith.constant 0 : index
    %c0_7 = arith.constant 0 : index
    %10 = vector.load %arg4[%c0_6, %c0_7] : memref<256x256xbf16, #tpu.memory_space<vmem>>, vector<256x256xbf16>
    %cst_8 = arith.constant dense<0.000000e+00> : vector<128x256xf32>
    %11 = tpu.matmul %9, %10, %cst_8 {dimension_numbers = #tpu.dot_dimension_numbers<[1], [0], [0], [1], [0, 0, 1, 1], [], []>} : vector<128x256xbf16>, vector<256x256xbf16>, vector<128x256xf32> -> vector<128x256xf32>
    %c0_9 = arith.constant 0 : index
    %c0_10 = arith.constant 0 : index
    %12 = vector.load %arg5[%c0_9, %c0_10] : memref<1x256xf32, #tpu.memory_space<vmem>>, vector<1x256xf32>
    %13 = vector.broadcast %12 : vector<1x256xf32> to vector<128x256xf32>
    %14 = arith.addf %11, %13 : vector<128x256xf32>
    %cst_11 = arith.constant 0.000000e+00 : f32
    %15 = vector.broadcast %cst_11 : f32 to vector<128x256xf32>
    %16 = arith.maximumf %14, %15 : vector<128x256xf32>
    %17 = arith.truncf %16 : vector<128x256xf32> to vector<128x256xbf16>
    %c0_12 = arith.constant 0 : index
    %c0_13 = arith.constant 0 : index
    %18 = vector.load %arg6[%c0_12, %c0_13] : memref<256x128xbf16, #tpu.memory_space<vmem>>, vector<256x128xbf16>
    %cst_14 = arith.constant dense<0.000000e+00> : vector<128x128xf32>
    %19 = tpu.matmul %17, %18, %cst_14 {dimension_numbers = #tpu.dot_dimension_numbers<[1], [0], [0], [1], [0, 0, 1, 1], [], []>} : vector<128x256xbf16>, vector<256x128xbf16>, vector<128x128xf32> -> vector<128x128xf32>
    %c0_15 = arith.constant 0 : index
    %c0_16 = arith.constant 0 : index
    %20 = vector.load %arg7[%c0_15, %c0_16] : memref<1x128xf32, #tpu.memory_space<vmem>>, vector<1x128xf32>
    %21 = vector.broadcast %20 : vector<1x128xf32> to vector<128x128xf32>
    %22 = arith.addf %19, %21 : vector<128x128xf32>
    %cst_17 = arith.constant dense<0xFF800000> : vector<128xf32>
    %23 = vector.multi_reduction <maximumf>, %22, %cst_17 [1] : vector<128x128xf32> to vector<128xf32>
    %24 = vector.shape_cast %23 : vector<128xf32> to vector<128x1xf32>
    %25 = vector.broadcast %24 : vector<128x1xf32> to vector<128x128xf32>
    %26 = arith.subf %22, %25 : vector<128x128xf32>
    %27 = math.exp %26 : vector<128x128xf32>
    %cst_18 = arith.constant dense<0.000000e+00> : vector<128xf32>
    %28 = vector.multi_reduction <add>, %27, %cst_18 [1] : vector<128x128xf32> to vector<128xf32>
    %29 = vector.shape_cast %28 : vector<128xf32> to vector<128x1xf32>
    %30 = vector.broadcast %29 : vector<128x1xf32> to vector<128x128xf32>
    %31 = arith.divf %27, %30 : vector<128x128xf32>
    %c0_19 = arith.constant 0 : index
    %c0_20 = arith.constant 0 : index
    %32 = vector.load %arg8[%c0_19, %c0_20] : memref<128x128xf32, #tpu.memory_space<vmem>>, vector<128x128xf32>
    tpu.vector_store %arg8[%c0_19, %c0_20], %31 {strides = array<i32>} : memref<128x128xf32, #tpu.memory_space<vmem>>, vector<128x128xf32>,
    return
  }
  func.func @transform_0(%arg0: i32) -> (i32, i32) {
    %c0_i32 = arith.constant 0 : i32
    %c0_i32_0 = arith.constant 0 : i32
    return %arg0, %c0_i32 : i32, i32
  }
  func.func @transform_1(%arg0: i32) -> (i32, i32) {
    %c0_i32 = arith.constant 0 : i32
    %c0_i32_0 = arith.constant 0 : i32
    %c0_i32_1 = arith.constant 0 : i32
    return %c0_i32, %c0_i32_0 : i32, i32
  }
  func.func @transform_2(%arg0: i32) -> (i32, i32) {
    %c0_i32 = arith.constant 0 : i32
    %c0_i32_0 = arith.constant 0 : i32
    %c0_i32_1 = arith.constant 0 : i32
    return %c0_i32, %c0_i32_0 : i32, i32
  }
  func.func @transform_3(%arg0: i32) -> (i32, i32) {
    %c0_i32 = arith.constant 0 : i32
    %c0_i32_0 = arith.constant 0 : i32
    %c0_i32_1 = arith.constant 0 : i32
    return %c0_i32, %c0_i32_0 : i32, i32
  }
  func.func @transform_4(%arg0: i32) -> (i32, i32) {
    %c0_i32 = arith.constant 0 : i32
    %c0_i32_0 = arith.constant 0 : i32
    %c0_i32_1 = arith.constant 0 : i32
    return %c0_i32, %c0_i32_0 : i32, i32
  }
  func.func @transform_5(%arg0: i32) -> (i32, i32) {
    %c0_i32 = arith.constant 0 : i32
    %c0_i32_0 = arith.constant 0 : i32
    %c0_i32_1 = arith.constant 0 : i32
    return %c0_i32, %c0_i32_0 : i32, i32
  }
  func.func @transform_6(%arg0: i32) -> (i32, i32) {
    %c0_i32 = arith.constant 0 : i32
    %c0_i32_0 = arith.constant 0 : i32
    %c0_i32_1 = arith.constant 0 : i32
    return %c0_i32, %c0_i32_0 : i32, i32
  }
  func.func @transform_7(%arg0: i32) -> (i32, i32) {
    %c0_i32 = arith.constant 0 : i32
    %c0_i32_0 = arith.constant 0 : i32
    return %arg0, %c0_i32 : i32, i32
  }
}

</mosaic_0001>

<bundles_post_ra>
// kernel: tpu_custom_call.1
= control target key start
LH: loop header
LB: loop body
LE: loop exit
PB: predicated region body
PF: predicated region fallthrough
CT: control target
= control target key end

     0   :  { %12 = vsyncpa [#allocation3], 0  ;;  %s3021_s0 = inlined_call_operand.vmem [shape: f32[256,300], index: 0, kind: input, shape index: {}]   ;;  %s3022_s1 = inlined_call_operand.vmem [shape: bf16[300,256], index: 1, kind: input, shape index: {}]   ;;  %s3023_s2 = inlined_call_operand.vmem [shape: f32[1,256], index: 2, kind: input, shape index: {}]   ;;  %s3024_s3 = inlined_call_operand.vmem [shape: bf16[256,256], index: 3, kind: input, shape index: {}]   ;;  %s3025_s4 = inlined_call_operand.vmem [shape: f32[1,256], index: 4, kind: input, shape index: {}]   ;;  %s3026_s5 = inlined_call_operand.vmem [shape: bf16[256,128], index: 5, kind: input, shape index: {}]   ;;  %s3027_s6 = inlined_call_operand.vmem [shape: f32[1,128], index: 6, kind: input, shape index: {}]   ;;  %s3028_s7 = inlined_call_operand.hbm [shape: f32[256,128], index: 7, kind: output, shape index: {}]  }
   0x1   :  { %14 = vsyncpa [#allocation3 + $0x1], 0  ;;  %s2256_s24 = smov 0   ;;  %s2258_s25 = smov 0  }
   0x2   :  { %s2260_s26 = smov 0   ;;  %s2262_s27 = smov 0  }
   0x3 LB: > { %s2277_s28 = sadd.s32 4294967295, %s2210_s27   ;;  %s1733_s29 = sadd.s32 4294967294, %s2210_s27   ;;  %s2210_s27 = sphi %s2262_s27, %s3034_s27   ;;  %s2206_s26 = sphi %s2260_s26, %s3033_s26   ;;  %s2202_s25 = sphi %s2258_s25, %s3032_s25   ;;  %s2198_s24 = sphi %s2256_s24, %s3031_s24  }
   0x4   : > { %s2281_s30 = sadd.s32 1, %s2210_s27   ;;  %s179_s8 = sadd.s32 1, %s2206_s26 }
   0x5   : > { %s176_s9 = ssub.s32 %s2210_s27, %s2281_s30  ;;  %p189_p0 = scmp.ne.s32.totalorder %s2206_s26, %s2202_s25 }
   0x6   : > { %p177_p1 = scmp.eq.s32.totalorder %s176_s9, 0  ;;  %p190_p2 = scmp.eq.s32.totalorder %s2277_s28, 1 }
   0x7   : > { %p195_p3 = scmp.ne.s32.totalorder %s2202_s25, %s2198_s24  ;;  %p196_p4 = scmp.eq.s32.totalorder %s1733_s29, 1 }
   0x8   : > { %s2292_s10 = scalar_select %p177_p1, %s2206_s26, %s179_s8  }
   0x9   : > { %p2294_p5 = por %p190_p2, %p189_p0  ;;  %p2298_p6 = por %p196_p4, %p195_p3 }
   0xa   : > { %p1736_p7 = scmp.ge.s32.totalorder %s2210_s27, 1  ;;  %p242_p8 = scmp.lt.s32.totalorder %s2210_s27, 3 }
   0xc   : > { %p243_p9 = pnand %p1736_p7, %p242_p8 }
   0xd   : > { %s1738_s8 = sshll.u32 (!%p243_p9), %s2277_s28, 4  ;;  %s1841_s29 = sshll.u32 (!%p243_p9), %s2277_s28, 11 }
   0xe   : > { %246 = sbr.rel (%p243_p9) target bundleno = 1081 (0x439), region = 48  ;;  %p276_p10 = scmp.lt.s32.totalorder (!%p243_p9), %s1738_s8, 31 }
   0xf   : > { %s2973_s16 = scalar_lea.hbm (!%p243_p9), %s3028_s7, %s1841_s29 }
  0x13   : > { %v1965_v0 = vld [vmem:[%s3022_s1 + $0x74] ss:$8 sps:$4 sm:$0xff]   ;;  %v1967_v1 = vld [vmem:[%s3022_s1 + $0x70] ss:$8 sps:$4 sm:$0xff]   ;;  %v2212_v2 = vmov 0   ;;  %s3036_s8 = smov (!%p276_p10, %s1738_s8), 31 }
  0x14   : > { %771 = vmatprep.mubr.bf16.mxu1 %v2212_v2  ;;  %626 = vmatprep.subr.bf16.mxu0 %v1965_v0  ;;  %v1968_v3 = vld [vmem:[%s3022_s1 + $0x64] ss:$8 sps:$4 sm:$0xff]   ;;  %v1970_v4 = vld [vmem:[%s3022_s1 + $0x60] ss:$8 sps:$4 sm:$0xff]   ;;  %v1971_v5 = vld [vmem:[%s3022_s1 + $0x54] ss:$8 sps:$4 sm:$0xff]  }
  0x15   : > { %627 = vmatpush1.bf16.msra.mxu0 %v1967_v1  ;;  %v1973_v6 = vld [vmem:[%s3022_s1 + $0x50] ss:$8 sps:$4 sm:$0xff]   ;;  %v1974_v7 = vld [vmem:[%s3022_s1 + $0x44] ss:$8 sps:$4 sm:$0xff]   ;;  %v1976_v8 = vld [vmem:[%s3022_s1 + $0x40] ss:$8 sps:$4 sm:$0xff]  }
  0x16   : > { %628 = vmatprep.subr.bf16.mxu0 %v1968_v3  ;;  %v1977_v9 = vld [vmem:[%s3022_s1 + $0x34] ss:$8 sps:$4 sm:$0xff]   ;;  %v1979_v10 = vld [vmem:[%s3022_s1 + $0x30] ss:$8 sps:$4 sm:$0xff]   ;;  %v1980_v11 = vld [vmem:[%s3022_s1 + $0x24] ss:$8 sps:$4 sm:$0xff]  }
  0x17   : > { %vm619_vm0 = vcmask 1045504   ;;  %v2003_v12 = vld [vmem:[%s3022_s1 + $0x124] ss:$8 sps:$4 sm:$0x3f]   ;;  %s1922_s13 = smul.u32 24, %s3036_s8  ;;  %vm594_vm1 = vcmask 359424  }
  0x18   : > { %v2006_v13 = vld [vmem:[%s3022_s1 + $0x120] ss:$8 sps:$4 sm:$0x3f]   ;;  %1778 = vmatprep.subr.msk.bf16.mxu1 %vm619_vm0, %v2003_v12  ;;  %v1983_v15 = vld [vmem:[%s3022_s1 + $0x14] ss:$8 sps:$4 sm:$0xff]  }
  0x19   : > { %629 = vmatpush1.bf16.msra.mxu0 %v1970_v4  ;;  %v1982_v14 = vld [vmem:[%s3022_s1 + $0x20] ss:$8 sps:$4 sm:$0xff]   ;;  %v621_v16 = vsel %vm619_vm0, %v2006_v13, 0  ;;  %v2009_v17 = vld [vmem:[%s3022_s1 + $0x114] ss:$8 sps:$4 sm:$0xff]   ;;  %s2360_s23 = scalar_lea.vmem %s3021_s0, %s1922_s13  ;;  %s2213_s13 = smov [#allocation2]  }
  0x1a   : > { %630 = vmatprep.subr.bf16.mxu0 %v1971_v5  ;;  %750 = vmatpush1.bf16.msra.mxu1 %v621_v16  ;;  %v2012_v18 = vld [vmem:[%s3022_s1 + $0x110] ss:$8 sps:$4 sm:$0xff]   ;;  %v2015_v20 = vld [vmem:[%s3022_s1 + $0x104] ss:$8 sps:$4 sm:$0xff]   ;;  %v2018_v22 = vld [vmem:[%s3022_s1 + $0x100] ss:$8 sps:$4 sm:$0xff]  }
  0x1b   : > { %751 = vmatprep.subr.bf16.mxu1 %v2009_v17  ;;  %v1985_v19 = vld [vmem:[%s3022_s1 + $0x10] ss:$8 sps:$4 sm:$0xff]   ;;  %v1986_v21 = vld [vmem:[%s3022_s1 + $0x4] ss:$8 sps:$4 sm:$0xff]   ;;  %v1988_v27 = vld [vmem:[%s3022_s1] ss:$8 sps:$4 sm:$0xff]  }
  0x1c   : > { %v286_v23 = vld [vmem:[%s2360_s23 + $0x10] sm:$0xff]  ;;  %v289_v24 = vld [vmem:[%s2360_s23 + $0x28] sm:$0xff]  ;;  %v288_v26 = vld [vmem:[%s2360_s23 + $0x20] sm:$0xff]  ;;  %s2154_s18 = sshll.u32 %s2213_s13, 4  ;;  %s2155_s18 = int_to_ptr.vmem [resolvable:$false] %s2154_s18 }
  0x1d   : > { %631 = vmatpush1.bf16.msra.mxu0 %v1973_v6  ;;  %v285_v25 = vld [vmem:[%s2360_s23 + $0x8] sm:$0xff]  ;;  %v1989_v29 = vld [vmem:[%s3022_s1 + $0xf4] ss:$8 sps:$4 sm:$0xff]   ;;  %v334_v30 = vpack.c.bf16 %v289_v24, %v286_v23  ;;  %v1991_v31 = vld [vmem:[%s3022_s1 + $0xf0] ss:$8 sps:$4 sm:$0xff]   ;;  %s2156_s19 = scalar_lea.vmem %s2155_s18, 4096 }
  0x1e   : > { %632 = vmatprep.subr.bf16.mxu0 %v1974_v7  ;;  %752 = vmatpush1.bf16.msra.mxu1 %v2012_v18  ;;  %v333_v28 = vpack.c.bf16 %v288_v26, %v285_v25  ;;  %v1992_v32 = vld [vmem:[%s3022_s1 + $0xe4] ss:$8 sps:$4 sm:$0xff]   ;;  %v295_v34 = vld [vmem:[%s2360_s23 + $0x58] sm:$0xff]  ;;  %v1994_v35 = vld [vmem:[%s3022_s1 + $0xe0] ss:$8 sps:$4 sm:$0xff]  }
  0x1f   : > { %753 = vmatprep.subr.bf16.mxu1 %v2015_v20  ;;  %v292_v33 = vld [vmem:[%s2360_s23 + $0x40] sm:$0xff]  ;;  %v1995_v36 = vld [vmem:[%s3022_s1 + $0xd4] ss:$8 sps:$4 sm:$0xff]   ;;  %v1997_v38 = vld [vmem:[%s3022_s1 + $0xd0] ss:$8 sps:$4 sm:$0xff]  }
  0x20   : > { %658 = vmatprep.mubr.bf16.mxu0 %v333_v28  ;;  %v337_v37 = vpack.c.bf16 %v295_v34, %v292_v33  ;;  %v1998_v39 = vld [vmem:[%s3022_s1 + $0xc4] ss:$8 sps:$4 sm:$0xff]   ;;  %v298_v40 = vld [vmem:[%s2360_s23 + $0x70] sm:$0xff]  ;;  %v2000_v44 = vld [vmem:[%s3022_s1 + $0xc0] ss:$8 sps:$4 sm:$0xff]  }
  0x21   : > { %633 = vmatpush1.bf16.msra.mxu0 %v1976_v8  ;;  %v301_v41 = vld [vmem:[%s2360_s23 + $0x88] sm:$0xff]  ;;  %v2022_v42 = vld [vmem:[%s3024_s3 + $0x70] ss:$8 sps:$4 sm:$0xff]   ;;  %v2024_v43 = vld [vmem:[%s3024_s3 + $0x74] ss:$8 sps:$4 sm:$0xff]  }
  0x22   : > { %634 = vmatprep.subr.bf16.mxu0 %v1977_v9  ;;  %754 = vmatpush1.bf16.msra.mxu1 %v2018_v22  ;;  %v2027_v45 = vld [vmem:[%s3024_s3 + $0x64] ss:$8 sps:$4 sm:$0xff]   ;;  %v2001_v46 = vld [vmem:[%s3022_s1 + $0xb4] ss:$8 sps:$4 sm:$0xff]   ;;  %v340_v47 = vpack.c.bf16 %v301_v41, %v298_v40  ;;  %v2025_v48 = vld [vmem:[%s3024_s3 + $0x60] ss:$8 sps:$4 sm:$0xff]  }
  0x23   : > { %1104 = vmatprep.subr.bf16.mxu1 %v2024_v43  ;;  %v2005_v49 = vld [vmem:[%s3022_s1 + $0xb0] ss:$8 sps:$4 sm:$0xff]   ;;  %v2030_v50 = vld [vmem:[%s3024_s3 + $0x54] ss:$8 sps:$4 sm:$0xff]   ;;  %v2007_v51 = vld [vmem:[%s3022_s1 + $0xa4] ss:$8 sps:$4 sm:$0xff]  }
  0x24   : > { %v304_v52 = vld [vmem:[%s2360_s23 + $0xa0] sm:$0xff]  ;;  %v307_v53 = vld [vmem:[%s2360_s23 + $0xb8] sm:$0xff]  ;;  %v310_v63 = vld [vmem:[%s2360_s23 + $0xd0] sm:$0xff] }
  0x25   : > { %635 = vmatpush1.bf16.msra.mxu0 %v1979_v10  ;;  %1779 = vmatmul.mubr.msk.bf16.vlgmr.msra.gmra.mxu1 %vm594_vm1, %v334_v30  ;;  %v2028_v54 = vld [vmem:[%s3024_s3 + $0x50] ss:$8 sps:$4 sm:$0xff]   ;;  %v2033_v55 = vld [vmem:[%s3024_s3 + $0x44] ss:$8 sps:$4 sm:$0xff]   ;;  %v2011_v56 = vld [vmem:[%s3022_s1 + $0xa0] ss:$8 sps:$4 sm:$0xff]   ;;  %v343_v58 = vpack.c.bf16 %v307_v53, %v304_v52 }
  0x26   : > { %636 = vmatprep.subr.bf16.mxu0 %v1980_v11  ;;  %781 = vmatprep.mubr.bf16.mxu1 %v2212_v2  ;;  %v2013_v57 = vld [vmem:[%s3022_s1 + $0x94] ss:$8 sps:$4 sm:$0xff]   ;;  %v2017_v59 = vld [vmem:[%s3022_s1 + $0x90] ss:$8 sps:$4 sm:$0xff]   ;;  %v2031_v60 = vld [vmem:[%s3024_s3 + $0x40] ss:$8 sps:$4 sm:$0xff]  }
  0x27   : > { %1105 = vmatpush1.bf16.msra.mxu1 %v2022_v42  ;;  %v2019_v61 = vld [vmem:[%s3022_s1 + $0x84] ss:$8 sps:$4 sm:$0xff]   ;;  %v2036_v62 = vld [vmem:[%s3024_s3 + $0x34] ss:$8 sps:$4 sm:$0xff]   ;;  %v2034_v1 = vld [vmem:[%s3024_s3 + $0x30] ss:$8 sps:$4 sm:$0xff]  }
  0x28   : > { %1106 = vmatprep.subr.bf16.mxu1 %v2027_v45  ;;  %v313_v0 = vld [vmem:[%s2360_s23 + $0xe8] sm:$0xff]  ;;  %v284_v4 = vld [vmem:[%s2360_s23] sm:$0xff]  ;;  %v287_v5 = vld [vmem:[%s2360_s23 + $0x18] sm:$0xff] }
  0x29   : > { %637 = vmatpush1.bf16.msra.mxu0 %v1982_v14  ;;  %v2021_v3 = vld [vmem:[%s3022_s1 + $0x80] ss:$8 sps:$4 sm:$0xff]   ;;  %v2039_v6 = vld [vmem:[%s3024_s3 + $0x24] ss:$8 sps:$4 sm:$0xff]   ;;  %v291_v7 = vld [vmem:[%s2360_s23 + $0x38] sm:$0xff]  ;;  %v346_v10 = vpack.c.bf16 %v313_v0, %v310_v63  ;;  %v332_v12 = vpack.c.bf16 %v287_v5, %v284_v4 }
  0x2a   : > { %638 = vmatprep.subr.bf16.mxu0 %v1983_v15  ;;  %v294_v8 = vld [vmem:[%s2360_s23 + $0x50] sm:$0xff]  ;;  %v2037_v9 = vld [vmem:[%s3024_s3 + $0x20] ss:$8 sps:$4 sm:$0xff]   ;;  %v319_v15 = vld [vmem:[%s2360_s23 + $0x118] sm:$0xff] }
  0x2b   : > { %1107 = vmatpush1.bf16.msra.mxu1 %v2025_v48  ;;  %v2042_v11 = vld [vmem:[%s3024_s3 + $0x14] ss:$8 sps:$4 sm:$0xff]   ;;  %v336_v13 = vpack.c.bf16 %v294_v8, %v291_v7  ;;  %v316_v14 = vld [vmem:[%s2360_s23 + $0x100] sm:$0xff]  ;;  %v2040_v16 = vld [vmem:[%s3024_s3 + $0x10] ss:$8 sps:$4 sm:$0xff]  }
  0x2c   : > { %1108 = vmatprep.subr.bf16.mxu1 %v2030_v50  ;;  %v2045_v17 = vld [vmem:[%s3024_s3 + $0x4] ss:$8 sps:$4 sm:$0xff]   ;;  %v290_v18 = vld [vmem:[%s2360_s23 + $0x30] sm:$0xff]  ;;  %v2043_v22 = vld [vmem:[%s3024_s3] ss:$8 sps:$4 sm:$0xff]   ;;  %v349_v23 = vpack.c.bf16 %v319_v15, %v316_v14 }
  0x2d   : > { %639 = vmatpush1.bf16.msra.mxu0 %v1985_v19  ;;  %1780 = vmatmul.mubr.msk.bf16.gmra.mxu1 %vm594_vm1, %v337_v37  ;;  %v293_v19 = vld [vmem:[%s2360_s23 + $0x48] sm:$0xff]  ;;  %v2048_v25 = vld [vmem:[%s3024_s3 + $0xf4] ss:$8 sps:$4 sm:$0xff]   ;;  %v328_v40 = vld [vmem:[%s2360_s23 + $0x160] sm:$0xff] }
  0x2e   : > { %640 = vmatprep.subr.bf16.mxu0 %v1986_v21  ;;  %791 = vmatprep.mubr.bf16.mxu1 %v2212_v2  ;;  %v297_v20 = vld [vmem:[%s2360_s23 + $0x68] sm:$0xff]  ;;  %v300_v21 = vld [vmem:[%s2360_s23 + $0x80] sm:$0xff]  ;;  %v335_v24 = vpack.c.bf16 %v293_v19, %v290_v18  ;;  %v303_v33 = vld [vmem:[%s2360_s23 + $0x98] sm:$0xff] }
  0x2f   : > { %1109 = vmatpush1.bf16.msra.mxu1 %v2028_v54  ;;  %v339_v26 = vpack.c.bf16 %v300_v21, %v297_v20  ;;  %v325_v28 = vld [vmem:[%s2360_s23 + $0x148] sm:$0xff]  ;;  %v306_v34 = vld [vmem:[%s2360_s23 + $0xb0] sm:$0xff]  ;;  %v331_v41 = vld [vmem:[%s2360_s23 + $0x178] sm:$0xff] }
  0x30   : > { %1110 = vmatprep.subr.bf16.mxu1 %v2033_v55  ;;  %v2051_v30 = vld [vmem:[%s3024_s3 + $0xe4] ss:$8 sps:$4 sm:$0xff]   ;;  %v2052_v42 = vld [vmem:[%s3024_s3 + $0xd0] ss:$8 sps:$4 sm:$0xff]   ;;  %v2055_v48 = vld [vmem:[%s3024_s3 + $0xc0] ss:$8 sps:$4 sm:$0xff]  }
  0x31   : > { %641 = vmatpush1.bf16.msra.mxu0 %v1988_v27  ;;  %v322_v27 = vld [vmem:[%s2360_s23 + $0x130] sm:$0xff]  ;;  %v2057_v43 = vld [vmem:[%s3024_s3 + $0xc4] ss:$8 sps:$4 sm:$0xff]   ;;  %v311_v52 = vld [vmem:[%s2360_s23 + $0xd8] sm:$0xff] }
  0x32   : > { %642 = vmatprep.subr.bf16.mxu0 %v1989_v29  ;;  %v2046_v29 = vld [vmem:[%s3024_s3 + $0xf0] ss:$8 sps:$4 sm:$0xff]   ;;  %v305_v45 = vld [vmem:[%s2360_s23 + $0xa8] sm:$0xff] }
  0x33   : > { %1111 = vmatpush1.bf16.msra.mxu1 %v2031_v60  ;;  %v315_v53 = vld [vmem:[%s2360_s23 + $0xf8] sm:$0xff]  ;;  %v318_v54 = vld [vmem:[%s2360_s23 + $0x110] sm:$0xff]  ;;  %v317_v60 = vld [vmem:[%s2360_s23 + $0x108] sm:$0xff] }
  0x34   : > { %1112 = vmatprep.subr.bf16.mxu1 %v2036_v62  ;;  %v324_v62 = vld [vmem:[%s2360_s23 + $0x140] sm:$0xff]  ;;  %v327_v4 = vld [vmem:[%s2360_s23 + $0x158] sm:$0xff]  ;;  %v330_v5 = vld [vmem:[%s2360_s23 + $0x170] sm:$0xff] }
  0x35   : > { %643 = vmatpush2.bf16.msra.mxu0 %v1991_v31  ;;  %1781 = vmatmul.mubr.msk.bf16.gmra.mxu1 %vm594_vm1, %v340_v47  ;;  %v296_v31 = vld [vmem:[%s2360_s23 + $0x60] sm:$0xff]  ;;  %v355_v47 = vpack.c.bf16 %v331_v41, %v328_v40  ;;  %v354_v7 = vpack.c.bf16 %v330_v5, %v327_v4  ;;  %v326_v8 = vld [vmem:[%s2360_s23 + $0x150] sm:$0xff]  ;;  %v2590_v18 = vld [vmem:[%s3026_s5 + $0x38] sm:$0xff]  }
  0x36   : > { %644 = vmatprep.subr.bf16.mxu0 %v1992_v32  ;;  %801 = vmatprep.mubr.bf16.mxu1 %v2212_v2  ;;  %v299_v32 = vld [vmem:[%s2360_s23 + $0x78] sm:$0xff]  ;;  %v2069_v15 = vld [vmem:[%s3024_s3 + $0x84] ss:$8 sps:$4 sm:$0xff]   ;;  %v2595_v19 = vld [vmem:[%s3026_s5 + $0x70] sm:$0xff]  }
  0x37   : > { %1113 = vmatpush1.bf16.msra.mxu1 %v2034_v1  ;;  %v338_v37 = vpack.c.bf16 %v299_v32, %v296_v31  ;;  %v320_v1 = vld [vmem:[%s2360_s23 + $0x120] sm:$0xff]  ;;  %v2064_v14 = vld [vmem:[%s3024_s3 + $0x90] ss:$8 sps:$4 sm:$0xff]   ;;  %v2607_v21 = vld [vmem:[%s3026_s5 + $0x68] sm:$0xff]  }
  0x38   : > { %1114 = vmatprep.subr.bf16.mxu1 %v2039_v6  ;;  %v2601_v20 = vld [vmem:[%s3026_s5 + $0x30] sm:$0xff]  }
  0x39   : > { %645 = vmatpush2.bf16.msra.mxu0 %v1994_v35  ;;  %v352_v35 = vpack.c.bf16 %v325_v28, %v322_v27 }
  0x3a   : > { %646 = vmatprep.subr.bf16.mxu0 %v1995_v36  ;;  %v2049_v36 = vld [vmem:[%s3024_s3 + $0xe0] ss:$8 sps:$4 sm:$0xff]  }
  0x3b   : > { %1115 = vmatpush1.bf16.msra.mxu1 %v2037_v9  ;;  %v329_v9 = vld [vmem:[%s2360_s23 + $0x168] sm:$0xff] }
  0x3c   : > { %1116 = vmatprep.subr.bf16.mxu1 %v2042_v11  ;;  %v2063_v11 = vld [vmem:[%s3024_s3 + $0xa4] ss:$8 sps:$4 sm:$0xff]  }
  0x3d   : > { %647 = vmatpush2.bf16.msra.mxu0 %v1997_v38  ;;  %1782 = vmatmul.mubr.msk.bf16.gmra.mxu1 %vm594_vm1, %v343_v58  ;;  %v2054_v38 = vld [vmem:[%s3024_s3 + $0xd4] ss:$8 sps:$4 sm:$0xff]  }
  0x3e   : > { %648 = vmatprep.subr.bf16.mxu0 %v1998_v39  ;;  %811 = vmatprep.mubr.bf16.mxu1 %v2212_v2  ;;  %v342_v39 = vpack.c.bf16 %v306_v34, %v303_v33  ;;  %v2060_v58 = vld [vmem:[%s3024_s3 + $0xb4] ss:$8 sps:$4 sm:$0xff]  }
  0x3f   : > { %1117 = vmatpush1.bf16.msra.mxu1 %v2040_v16  ;;  %v2067_v16 = vld [vmem:[%s3024_s3 + $0x80] ss:$8 sps:$4 sm:$0xff]  }
  0x40   : > { %1118 = vmatprep.subr.bf16.mxu1 %v2045_v17  ;;  %v2070_v17 = vld [vmem:[%s3026_s5 + $0x78] sm:$0xff]  }
  0x41   : > { %649 = vmatpush2.bf16.msra.mxu0 %v2000_v44  ;;  %v302_v44 = vld [vmem:[%s2360_s23 + $0x90] sm:$0xff] }
  0x42   : > { %650 = vmatprep.subr.bf16.mxu0 %v2001_v46  ;;  %v312_v46 = vld [vmem:[%s2360_s23 + $0xe0] sm:$0xff] }
  0x43   : > { %1119 = vmatpush1.bf16.msra.mxu1 %v2043_v22  ;;  %v2613_v22 = vld [vmem:[%s3026_s5 + $0x28] sm:$0xff]  }
  0x44   : > { %1120 = vmatprep.subr.bf16.mxu1 %v2048_v25  ;;  %v2631_v25 = vld [vmem:[%s3026_s5 + $0x58] sm:$0xff]  }
  0x45   : > { %651 = vmatpush2.bf16.msra.mxu0 %v2005_v49  ;;  %1783 = vmatmul.mubr.msk.bf16.gmra.mxu1 %vm594_vm1, %v346_v10  ;;  %v341_v49 = vpack.c.bf16 %v305_v45, %v302_v44  ;;  %v353_v10 = vpack.c.bf16 %v329_v9, %v326_v8 }
  0x46   : > { %652 = vmatprep.subr.bf16.mxu0 %v2007_v51  ;;  %821 = vmatprep.mubr.bf16.mxu1 %v2212_v2  ;;  %v308_v51 = vld [vmem:[%s2360_s23 + $0xc0] sm:$0xff] }
  0x47   : > { %1121 = vmatpush2.bf16.msra.mxu1 %v2046_v29  ;;  %v344_v55 = vpack.c.bf16 %v311_v52, %v308_v51 }
  0x48   : > { %1122 = vmatprep.subr.bf16.mxu1 %v2051_v30 }
  0x49   : > { %653 = vmatpush2.bf16.msra.mxu0 %v2011_v56  ;;  %v348_v56 = vpack.c.bf16 %v318_v54, %v315_v53 }
  0x4a   : > { %654 = vmatprep.subr.bf16.mxu0 %v2013_v57  ;;  %v2058_v57 = vld [vmem:[%s3024_s3 + $0xb0] ss:$8 sps:$4 sm:$0xff]  }
  0x4b   : > { %1123 = vmatpush2.bf16.msra.mxu1 %v2049_v36 }
  0x4c   : > { %1124 = vmatprep.subr.bf16.mxu1 %v2054_v38  ;;  %v396_v38 = vlaneseq }
  0x4d   : > { %655 = vmatpush2.bf16.msra.mxu0 %v2017_v59  ;;  %1784 = vmatmul.mubr.msk.bf16.gmra.mxu1 %vm594_vm1, %v349_v23  ;;  %v314_v59 = vld [vmem:[%s2360_s23 + $0xf0] sm:$0xff]  ;;  %v2619_v23 = vld [vmem:[%s3026_s5 + $0x60] sm:$0xff]  }
  0x4e   : > { %656 = vmatprep.subr.bf16.mxu0 %v2019_v61  ;;  %831 = vmatprep.mubr.bf16.mxu1 %v2212_v2  ;;  %v321_v61 = vld [vmem:[%s2360_s23 + $0x128] sm:$0xff]  ;;  %v347_v63 = vpack.c.bf16 %v317_v60, %v314_v59  ;;  %v2651_v41 = vshrl.u32 %v396_v38, 7 }
  0x4f   : > { %1125 = vmatpush2.bf16.msra.mxu1 %v2052_v42  ;;  %v351_v0 = vpack.c.bf16 %v324_v62, %v321_v61 }
  0x50   : > { %1126 = vmatprep.subr.bf16.mxu1 %v2057_v43  ;;  %v402_v43 = vsub.s32 1, %v2651_v41  ;;  %v398_v44 = vsub.s32 0, %v2651_v41 }
  0x51   : > { %657 = vmatpush2.bf16.msra.mxu0 %v2021_v3  ;;  %v323_v3 = vld [vmem:[%s2360_s23 + $0x138] sm:$0xff] }
  0x52   : > { %v350_v6 = vpack.c.bf16 %v323_v3, %v320_v1  ;;  %1842 = vmatprep.subr.bf16.mxu0 %v2070_v17 }
  0x53   : > { %1127 = vmatpush2.bf16.msra.mxu1 %v2055_v48 }
  0x54   : > { %659 = vmatmul.mubr.bf16.vlgmr.msra.gmra.mxu0 %v332_v12  ;;  %1128 = vmatprep.subr.bf16.mxu1 %v2060_v58  ;;  %v2061_v12 = vld [vmem:[%s3024_s3 + $0xa0] ss:$8 sps:$4 sm:$0xff]  }
  0x55   : > { %668 = vmatprep.mubr.bf16.mxu0 %v336_v13  ;;  %1785 = vmatmul.mubr.msk.bf16.gmra.mxu1 %vm594_vm1, %v352_v35  ;;  %v2066_v13 = vld [vmem:[%s3024_s3 + $0x94] ss:$8 sps:$4 sm:$0xff]  }
  0x56   : > { %841 = vmatprep.mubr.bf16.mxu1 %v2212_v2  ;;  %v309_v2 = vld [vmem:[%s2360_s23 + $0xc8] sm:$0xff]  ;;  %1843 = vmatpush3.bf16.msra.mxu0 %v2590_v18  ;;  %s272_s23 = sand.u32 1, %s2202_s25  }
  0x57   : > { %v345_v50 = vpack.c.bf16 %v312_v46, %v309_v2  ;;  %1129 = vmatpush2.bf16.msra.mxu1 %v2058_v57  ;;  %1844 = vmatprep.subr.bf16.mxu0 %v2595_v19  ;;  %v394_v2 = vld [vmem:[%s3023_s2] sm:$0x3]  ;;  %s1737_s8 = sshll.u32 %s272_s23, 7  ;;  %s2981_s17 = scalar_lea.sflag [#allocation3], %s272_s23 }
  0x58   : > { %1130 = vmatprep.subr.bf16.mxu1 %v2063_v11  ;;  %v2664_v46 = vrot.slane %v394_v2, %v402_v43  ;;  %s2937_s22 = scalar_lea.vmem [#allocation2], %s1737_s8 }
  0x59   : > { %s1671_s9 = sshll.u32 %s2937_s22, 4  ;;  %s2975_s9 = int_to_ptr.vmem [resolvable:$true] %s1671_s9 }
  0x5a   : > { %1845 = vmatpush3.bf16.msra.mxu0 %v2601_v20  ;;  %s2150_s28 = scalar_lea.vmem %s2975_s9, 2048  ;;  %p2157_p0 = scmp.lt.s32.totalorder %s2975_s9, %s2155_s18 }
  0x5b   : > { %1131 = vmatpush2.bf16.msra.mxu1 %v2061_v12  ;;  %1846 = vmatprep.subr.bf16.mxu0 %v2607_v21  ;;  %p2151_p11 = scmp.ne.s32.totalorder %s2975_s9, %s2150_s28  ;;  %p2158_p1 = scmp.lt.s32.totalorder %s2156_s19, %s2150_s28 }
  0x5c   : > { %669 = vmatmul.mubr.bf16.gmra.mxu0 %v335_v24  ;;  %1132 = vmatprep.subr.bf16.mxu1 %v2066_v13  ;;  %v2625_v24 = vld [vmem:[%s3026_s5 + $0x20] sm:$0xff]  }
  0x5d   : > { %678 = vmatprep.mubr.bf16.mxu0 %v339_v26  ;;  %1786 = vmatmul.mubr.msk.bf16.gmra.mxu1 %vm594_vm1, %v355_v47  ;;  %v2637_v26 = vld [vmem:[%s3026_s5 + $0x18] sm:$0xff]   ;;  %v2668_v47 = vrot.slane %v394_v2, %v398_v44  ;;  %p2152_p12 = pnand %p2151_p11, %p2294_p5  ;;  %p2159_p2 = por %p2158_p1, %p2157_p0 }
  0x5e   : > { %1847 = vmatpush3.bf16.msra.mxu0 %v2613_v22 }
  0x5f   : > { %1133 = vmatpush2.bf16.msra.mxu1 %v2064_v14  ;;  %1848 = vmatprep.subr.bf16.mxu0 %v2619_v23  ;;  %p2153_p13 = pneg %p2152_p12 }
  0x60   : > { %1134 = vmatprep.subr.bf16.mxu1 %v2069_v15 }
  0x61   : > { %p2160_p3 = pnand %p2159_p2, %p2153_p13 }
  0x62   : > { %1849 = vmatpush3.bf16.msra.mxu0 %v2625_v24 }
  0x63   : > { %1135 = vmatpush2.bf16.msra.mxu1 %v2067_v16  ;;  %1850 = vmatprep.subr.bf16.mxu0 %v2631_v25 }
  0x64   : > { %679 = vmatmul.mubr.bf16.gmra.mxu0 %v338_v37  ;;  %1906 = vmatprep.subr.bf16.mxu1 %v2070_v17 }
  0x65   : > { %688 = vmatprep.mubr.bf16.mxu0 %v342_v39 }
  0x66   : > { %1851 = vmatpush3.bf16.msra.mxu0 %v2637_v26 }
  0x6c   : > { %689 = vmatmul.mubr.bf16.gmra.mxu0 %v341_v49 }
  0x6d   : > { %698 = vmatprep.mubr.bf16.mxu0 %v345_v50 }
  0x74   : > { %699 = vmatmul.mubr.bf16.gmra.mxu0 %v344_v55 }
  0x75   : > { %708 = vmatprep.mubr.bf16.mxu0 %v348_v56 }
  0x7c   : > { %709 = vmatmul.mubr.bf16.gmra.mxu0 %v347_v63 }
  0x7d   : > { %718 = vmatprep.mubr.bf16.mxu0 %v351_v0 }
  0x84   : > { %719 = vmatmul.mubr.bf16.gmra.mxu0 %v350_v6 }
  0x85   : > { %728 = vmatprep.mubr.bf16.mxu0 %v354_v7 }
  0x8c   : > { %729 = vmatmul.mubr.bf16.gmra.mxu0 %v353_v10 }
  0xe5   : > { %v773_v27 = vpop.f32.mrf.mxu1 }
  0xe7   : > { %v775_v28 = vpop.f32.mrf.mxu1 }
  0xe9   : > { %v777_v29 = vpop.f32.mrf.mxu1 }
  0xeb   : > { %v779_v30 = vpop.f32.mrf.mxu1 }
  0xed   : > { %v783_v31 = vpop.f32.mrf.mxu1 }
  0xef   : > { %v785_v32 = vpop.f32.mrf.mxu1 }
  0xf1   : > { %v787_v33 = vpop.f32.mrf.mxu1 }
  0xf3   : > { %v789_v34 = vpop.f32.mrf.mxu1 }
  0xf5   : > { %v2641_v35 = vpop.f32.mrf.mxu1 }
  0xf7   : > { %v2643_v36 = vpop.f32.mrf.mxu1 }
  0xf9   : > { %v2645_v37 = vpop.f32.mrf.mxu1 }
  0xfb   : > { %v2647_v39 = vpop.f32.mrf.mxu1 }
  0xfd   : > { %v2649_v40 = vpop.f32.mrf.mxu1 }
  0xff   : > { %v2653_v42 = vpop.f32.mrf.mxu1 }
 0x101   : > { %v2657_v45 = vpop.f32.mrf.mxu1 }
 0x103   : > { %v2670_v49 = vpop.f32.mrf.mxu1 }
 0x105   : > { %v2674_v54 = vpop.f32.mrf.mxu1 }
 0x107   : > { %v2678_v62 = vpop.f32.mrf.mxu1 }
 0x109   : > { %v2682_v9 = vpop.f32.mrf.mxu1 }
 0x114   : > { %v660_v48 = vpop.f32.mrf.mxu0 }
 0x115   : > { %v661_v52 = vadd.f32 %v660_v48, %v2668_v47 }
 0x116   : > { %v662_v50 = vpop.f32.mrf.mxu0 }
 0x117   : > { %v663_v51 = vadd.f32 %v662_v50, %v2664_v46  ;;  %v774_v60 = vadd.f32 %v773_v27, %v661_v52 }
 0x118   : > { %v664_v53 = vpop.f32.mrf.mxu0 }
 0x119   : > { %v665_v55 = vadd.f32 %v664_v53, %v2668_v47  ;;  %v776_v57 = vadd.f32 %v775_v28, %v663_v51  ;;  %v852_v6 = vmax.f32 %v774_v60, 0.0  ;;  %v2686_v28 = vpop.f32.mrf.mxu1 }
 0x11a   : > { %v666_v56 = vpop.f32.mrf.mxu0 }
 0x11b   : > { %v778_v58 = vadd.f32 %v777_v29, %v665_v55  ;;  %v667_v59 = vadd.f32 %v666_v56, %v2664_v46  ;;  %v853_v3 = vmax.f32 %v776_v57, 0.0 }
 0x11c   : > { %v670_v61 = vpop.f32.mrf.mxu0 }
 0x11d   : > { %v780_v63 = vadd.f32 %v779_v30, %v667_v59  ;;  %v854_v0 = vmax.f32 %v778_v58, 0.0  ;;  %v671_v7 = vadd.f32 %v670_v61, %v2668_v47 }
 0x11e   : > { %v672_v1 = vpop.f32.mrf.mxu0 }
 0x11f   : > { %v855_v4 = vmax.f32 %v780_v63, 0.0  ;;  %v673_v5 = vadd.f32 %v672_v1, %v2664_v46  ;;  %v884_v12 = vpack.c.bf16 %v854_v0, %v852_v6  ;;  %v784_v17 = vadd.f32 %v783_v31, %v671_v7  ;;  %v2692_v31 = vpop.f32.mrf.mxu1 }
 0x120   : > { %v674_v8 = vpop.f32.mrf.mxu0 }
 0x121   : > { %v675_v10 = vadd.f32 %v674_v8, %v2668_v47  ;;  %v885_v11 = vpack.c.bf16 %v855_v4, %v853_v3  ;;  %v786_v14 = vadd.f32 %v785_v32, %v673_v5  ;;  %v2701_v59 = vpop.f32.mrf.mxu1 }
 0x122   : > { %v676_v13 = vpop.f32.mrf.mxu0 }
 0x123   : > { %v788_v15 = vadd.f32 %v787_v33, %v675_v10  ;;  %v677_v16 = vadd.f32 %v676_v13, %v2664_v46  ;;  %1136 = vmatprep.mubr.bf16.mxu1 %v885_v11  ;;  %v857_v2 = vmax.f32 %v786_v14, 0.0  ;;  %v856_v33 = vmax.f32 %v784_v17, 0.0  ;;  %v827_v1 = vpop.f32.mrf.mxu1 }
 0x124   : > { %v680_v27 = vpop.f32.mrf.mxu0  ;;  %1137 = vmatmul.mubr.bf16.vlgmr.msra.gmra.mxu1 %v884_v12 }
 0x125   : > { %v790_v29 = vadd.f32 %v789_v34, %v677_v16  ;;  %1914 = vmatpush3.bf16.msra.mxu1 %v2590_v18  ;;  %v858_v30 = vmax.f32 %v788_v15, 0.0  ;;  %v681_v50 = vadd.f32 %v680_v27, %v2668_v47  ;;  %v829_v10 = vpop.f32.mrf.mxu1 }
 0x126   : > { %v682_v38 = vpop.f32.mrf.mxu0  ;;  %1907 = vmatprep.subr.bf16.mxu1 %v2595_v19 }
 0x127   : > { %v859_v48 = vmax.f32 %v790_v29, 0.0  ;;  %v683_v32 = vadd.f32 %v682_v38, %v2664_v46  ;;  %v886_v34 = vpack.c.bf16 %v858_v30, %v856_v33  ;;  %v794_v57 = vadd.f32 %v2641_v35, %v681_v50  ;;  %v833_v16 = vpop.f32.mrf.mxu1 }
 0x128   : > { %v684_v51 = vpop.f32.mrf.mxu0 }
 0x129   : > { %v685_v52 = vadd.f32 %v684_v51, %v2668_v47  ;;  %v887_v53 = vpack.c.bf16 %v859_v48, %v857_v2  ;;  %1915 = vmatpush3.bf16.msra.mxu1 %v2601_v20  ;;  %v796_v19 = vadd.f32 %v2643_v36, %v683_v32  ;;  %v860_v63 = vmax.f32 %v794_v57, 0.0  ;;  %v835_v48 = vpop.f32.mrf.mxu1 }
 0x12a   : > { %v686_v18 = vpop.f32.mrf.mxu0  ;;  %1908 = vmatprep.subr.bf16.mxu1 %v2607_v21 }
 0x12b   : > { %v798_v55 = vadd.f32 %v2645_v37, %v685_v52  ;;  %v687_v56 = vadd.f32 %v686_v18, %v2664_v46  ;;  %1146 = vmatprep.mubr.bf16.mxu1 %v887_v53  ;;  %v861_v21 = vmax.f32 %v796_v19, 0.0 }
 0x12c   : > { %v690_v58 = vpop.f32.mrf.mxu0  ;;  %1147 = vmatmul.mubr.bf16.gmra.mxu1 %v886_v34  ;;  %v837_v34 = vpop.f32.mrf.mxu1 }
 0x12d   : > { %v800_v60 = vadd.f32 %v2647_v39, %v687_v56  ;;  %1916 = vmatpush3.bf16.msra.mxu1 %v2613_v22  ;;  %v862_v20 = vmax.f32 %v798_v55, 0.0  ;;  %v691_v0 = vadd.f32 %v690_v58, %v2668_v47 }
 0x12e   : > { %v692_v61 = vpop.f32.mrf.mxu0  ;;  %1909 = vmatprep.subr.bf16.mxu1 %v2619_v23 }
 0x12f   : > { %v863_v36 = vmax.f32 %v800_v60, 0.0  ;;  %v693_v37 = vadd.f32 %v692_v61, %v2664_v46  ;;  %v888_v22 = vpack.c.bf16 %v862_v20, %v860_v63  ;;  %v804_v7 = vadd.f32 %v2649_v40, %v691_v0  ;;  %v839_v61 = vpop.f32.mrf.mxu1 }
 0x130   : > { %v694_v35 = vpop.f32.mrf.mxu0 }
 0x131   : > { %v695_v3 = vadd.f32 %v694_v35, %v2668_v47  ;;  %v889_v4 = vpack.c.bf16 %v863_v36, %v861_v21  ;;  %1917 = vmatpush3.bf16.msra.mxu1 %v2625_v24  ;;  %v806_v23 = vadd.f32 %v2653_v42, %v693_v37  ;;  %v864_v14 = vmax.f32 %v804_v7, 0.0 }
 0x132   : > { %v696_v39 = vpop.f32.mrf.mxu0  ;;  %1910 = vmatprep.subr.bf16.mxu1 %v2631_v25 }
 0x133   : > { %v808_v5 = vadd.f32 %v2657_v45, %v695_v3  ;;  %v697_v6 = vadd.f32 %v696_v39, %v2664_v46  ;;  %1156 = vmatprep.mubr.bf16.mxu1 %v889_v4  ;;  %v865_v13 = vmax.f32 %v806_v23, 0.0 }
 0x134   : > { %v700_v8 = vpop.f32.mrf.mxu0  ;;  %1157 = vmatmul.mubr.bf16.gmra.mxu1 %v888_v22 }
 0x135   : > { %v810_v11 = vadd.f32 %v2670_v49, %v697_v6  ;;  %1918 = vmatpush3.bf16.msra.mxu1 %v2637_v26  ;;  %v866_v24 = vmax.f32 %v808_v5, 0.0  ;;  %v701_v45 = vadd.f32 %v700_v8, %v2668_v47 }
 0x136   : > { %v702_v12 = vpop.f32.mrf.mxu0 }
 0x137   : > { %v867_v25 = vmax.f32 %v810_v11, 0.0  ;;  %v703_v42 = vadd.f32 %v702_v12, %v2664_v46  ;;  %v890_v29 = vpack.c.bf16 %v866_v24, %v864_v14  ;;  %v814_v38 = vadd.f32 %v2674_v54, %v701_v45 }
 0x138   : > { %v704_v15 = vpop.f32.mrf.mxu0 }
 0x139   : > { %v705_v40 = vadd.f32 %v704_v15, %v2668_v47  ;;  %v891_v17 = vpack.c.bf16 %v867_v25, %v865_v13  ;;  %v816_v49 = vadd.f32 %v2678_v62, %v703_v42  ;;  %v868_v18 = vmax.f32 %v814_v38, 0.0 }
 0x13a   : > { %v706_v27 = vpop.f32.mrf.mxu0 }
 0x13b   : > { %v818_v26 = vadd.f32 %v2682_v9, %v705_v40  ;;  %v707_v30 = vadd.f32 %v706_v27, %v2664_v46  ;;  %1166 = vmatprep.mubr.bf16.mxu1 %v891_v17  ;;  %v869_v51 = vmax.f32 %v816_v49, 0.0 }
 0x13c   : > { %v710_v2 = vpop.f32.mrf.mxu0  ;;  %1167 = vmatmul.mubr.bf16.gmra.mxu1 %v890_v29 }
 0x13d   : > { %v820_v32 = vadd.f32 %v2686_v28, %v707_v30  ;;  %v870_v33 = vmax.f32 %v818_v26, 0.0  ;;  %v711_v62 = vadd.f32 %v710_v2, %v2668_v47 }
 0x13e   : > { %v712_v50 = vpop.f32.mrf.mxu0 }
 0x13f   : > { %v871_v52 = vmax.f32 %v820_v32, 0.0  ;;  %v713_v53 = vadd.f32 %v712_v50, %v2664_v46  ;;  %v892_v56 = vpack.c.bf16 %v870_v33, %v868_v18  ;;  %v824_v60 = vadd.f32 %v2692_v31, %v711_v62  ;;  %v2082_v62 = vld [vmem:[%s3026_s5 + $0x48] sm:$0xff]  }
 0x140   : > { %v714_v9 = vpop.f32.mrf.mxu0 }
 0x141   : > { %v715_v19 = vadd.f32 %v714_v9, %v2668_v47  ;;  %v893_v55 = vpack.c.bf16 %v871_v52, %v869_v51  ;;  %v826_v57 = vadd.f32 %v2701_v59, %v713_v53  ;;  %v872_v3 = vmax.f32 %v824_v60, 0.0  ;;  %v2083_v9 = vld [vmem:[%s3026_s5 + $0x8] sm:$0xff]  }
 0x142   : > { %v716_v54 = vpop.f32.mrf.mxu0 }
 0x143   : > { %v828_v58 = vadd.f32 %v827_v1, %v715_v19  ;;  %v717_v28 = vadd.f32 %v716_v54, %v2664_v46  ;;  %1176 = vmatprep.mubr.bf16.mxu1 %v893_v55  ;;  %v873_v63 = vmax.f32 %v826_v57, 0.0  ;;  %v843_v1 = vpop.f32.mrf.mxu1  ;;  %v2085_v19 = vld [vmem:[%s3026_s5] sm:$0xff]  }
 0x144   : > { %v720_v20 = vpop.f32.mrf.mxu0  ;;  %1177 = vmatmul.mubr.bf16.gmra.mxu1 %v892_v56  ;;  %v932_v55 = vld [vmem:[%s3025_s4] sm:$0x3] }
 0x145   : > { %v830_v21 = vadd.f32 %v829_v10, %v717_v28  ;;  %v874_v36 = vmax.f32 %v828_v58, 0.0  ;;  %v721_v4 = vadd.f32 %v720_v20, %v2668_v47  ;;  %v845_v10 = vpop.f32.mrf.mxu1  ;;  %v2762_v56 = vrot.slane %v932_v55, %v402_v43 }
 0x146   : > { %v722_v37 = vpop.f32.mrf.mxu0  ;;  %v2766_v57 = vrot.slane %v932_v55, %v398_v44 }
 0x147   : > { %v875_v0 = vmax.f32 %v830_v21, 0.0  ;;  %v723_v35 = vadd.f32 %v722_v37, %v2664_v46  ;;  %v894_v31 = vpack.c.bf16 %v874_v36, %v872_v3  ;;  %v834_v8 = vadd.f32 %v833_v16, %v721_v4  ;;  %v847_v40 = vpop.f32.mrf.mxu1 }
 0x148   : > { %v724_v59 = vpop.f32.mrf.mxu0 }
 0x149   : > { %v725_v39 = vadd.f32 %v724_v59, %v2668_v47  ;;  %v895_v22 = vpack.c.bf16 %v875_v0, %v873_v63  ;;  %v836_v5 = vadd.f32 %v835_v48, %v723_v35  ;;  %v876_v45 = vmax.f32 %v834_v8, 0.0  ;;  %v849_v48 = vpop.f32.mrf.mxu1 }
 0x14a   : > { %v726_v23 = vpop.f32.mrf.mxu0 }
 0x14b   : > { %v838_v6 = vadd.f32 %v837_v34, %v725_v39  ;;  %v727_v7 = vadd.f32 %v726_v23, %v2664_v46  ;;  %1186 = vmatprep.mubr.bf16.mxu1 %v895_v22  ;;  %v877_v25 = vmax.f32 %v836_v5, 0.0  ;;  %v2084_v34 = vld [vmem:[%s3026_s5 + $0x40] sm:$0xff]  }
 0x14c   : > { %v730_v11 = vpop.f32.mrf.mxu0  ;;  %1187 = vmatmul.mubr.bf16.gmra.mxu1 %v894_v31 }
 0x14d   : > { %v840_v24 = vadd.f32 %v839_v61, %v727_v7  ;;  %v878_v12 = vmax.f32 %v838_v6, 0.0  ;;  %v731_v15 = vadd.f32 %v730_v11, %v2668_v47 }
 0x14e   : > { %v732_v13 = vpop.f32.mrf.mxu0 }
 0x14f   : > { %v879_v42 = vmax.f32 %v840_v24, 0.0  ;;  %v733_v14 = vadd.f32 %v732_v13, %v2664_v46  ;;  %v896_v16 = vpack.c.bf16 %v878_v12, %v876_v45  ;;  %v844_v2 = vadd.f32 %v843_v1, %v731_v15 }
 0x150   : > { %v734_v17 = vpop.f32.mrf.mxu0 }
 0x151   : > { %v735_v27 = vadd.f32 %v734_v17, %v2668_v47  ;;  %v897_v29 = vpack.c.bf16 %v879_v42, %v877_v25  ;;  %v846_v26 = vadd.f32 %v845_v10, %v733_v14  ;;  %v880_v52 = vmax.f32 %v844_v2, 0.0  ;;  %v2080_v47 = vld [vmem:[%s3026_s5 + $0x50] sm:$0xff]  }
 0x152   : > { %v736_v49 = vpop.f32.mrf.mxu0  ;;  %1852 = vmatprep.subr.bf16.mxu0 %v2080_v47  ;;  %1911 = vmatprep.subr.bf16.mxu1 %v2080_v47 }
 0x153   : > { %v848_v30 = vadd.f32 %v847_v40, %v735_v27  ;;  %v737_v38 = vadd.f32 %v736_v49, %v2664_v46  ;;  %1196 = vmatprep.mubr.bf16.mxu1 %v897_v29  ;;  %v881_v50 = vmax.f32 %v846_v26, 0.0  ;;  %v2081_v46 = vld [vmem:[%s3026_s5 + $0x10] sm:$0xff]  }
 0x154   : > { %1197 = vmatmul.mubr.bf16.gmra.mxu1 %v896_v16  ;;  %1853 = vmatpush3.bf16.msra.mxu0 %v2081_v46 }
 0x155   : > { %v850_v32 = vadd.f32 %v849_v48, %v737_v38  ;;  %v882_v33 = vmax.f32 %v848_v30, 0.0  ;;  %1919 = vmatpush3.bf16.msra.mxu1 %v2081_v46  ;;  %1854 = vmatprep.subr.bf16.mxu0 %v2082_v62 }
 0x156   : > { %1912 = vmatprep.subr.bf16.mxu1 %v2082_v62 }
 0x157   : > { %v883_v51 = vmax.f32 %v850_v32, 0.0  ;;  %v898_v18 = vpack.c.bf16 %v882_v33, %v880_v52 }
 0x158   : > { %1855 = vmatpush3.bf16.msra.mxu0 %v2083_v9 }
 0x159   : > { %v899_v53 = vpack.c.bf16 %v883_v51, %v881_v50  ;;  %1920 = vmatpush3.bf16.msra.mxu1 %v2083_v9  ;;  %1856 = vmatprep.subr.bf16.mxu0 %v2084_v34 }
 0x15a   : > { %1913 = vmatprep.subr.bf16.mxu1 %v2084_v34 }
 0x15b   : > { %1206 = vmatprep.mubr.bf16.mxu1 %v899_v53 }
 0x15c   : > { %1207 = vmatmul.mubr.bf16.gmra.mxu1 %v898_v18  ;;  %1857 = vmatpush3.bf16.msra.mxu0 %v2085_v19 }
 0x15d   : > { %1921 = vmatpush3.bf16.msra.mxu1 %v2085_v19 }
 0x1e4   : > { %v1138_v54 = vpop.f32.mrf.mxu1 }
 0x1e5   : > { %v1139_v61 = vadd.f32 %v1138_v54, %v2766_v57 }
 0x1e6   : > { %v1140_v58 = vpop.f32.mrf.mxu1 }
 0x1e7   : > { %v1141_v60 = vadd.f32 %v1140_v58, %v2762_v56  ;;  %v1217_v35 = vmax.f32 %v1139_v61, 0.0 }
 0x1e8   : > { %v1142_v28 = vpop.f32.mrf.mxu1 }
 0x1e9   : > { %v1143_v20 = vadd.f32 %v1142_v28, %v2766_v57  ;;  %v1218_v0 = vmax.f32 %v1141_v60, 0.0 }
 0x1ea   : > { %v1144_v21 = vpop.f32.mrf.mxu1 }
 0x1eb   : > { %v1145_v36 = vadd.f32 %v1144_v21, %v2762_v56  ;;  %v1219_v37 = vmax.f32 %v1143_v20, 0.0 }
 0x1ec   : > { %v1148_v63 = vpop.f32.mrf.mxu1 }
 0x1ed   : > { %v1220_v43 = vmax.f32 %v1145_v36, 0.0  ;;  %v1249_v44 = vpack.c.bf16 %v1219_v37, %v1217_v35  ;;  %v1149_v39 = vadd.f32 %v1148_v63, %v2766_v57 }
 0x1ee   : > { %v1150_v3 = vpop.f32.mrf.mxu1 }
 0x1ef   : > { %v1250_v41 = vpack.c.bf16 %v1220_v43, %v1218_v0  ;;  %v1151_v59 = vadd.f32 %v1150_v3, %v2762_v56  ;;  %v1221_v8 = vmax.f32 %v1149_v39, 0.0 }
 0x1f0   : > { %v1152_v4 = vpop.f32.mrf.mxu1 }
 0x1f1   : > { %v1153_v1 = vadd.f32 %v1152_v4, %v2766_v57  ;;  %1432 = vmatprep.mubr.bf16.mxu0 %v1250_v41  ;;  %v1222_v6 = vmax.f32 %v1151_v59, 0.0 }
 0x1f2   : > { %v1154_v22 = vpop.f32.mrf.mxu1  ;;  %1433 = vmatmul.mubr.bf16.vlgmr.msra.gmra.mxu0 %v1249_v44 }
 0x1f3   : > { %v1155_v23 = vadd.f32 %v1154_v22, %v2762_v56  ;;  %v1223_v31 = vmax.f32 %v1153_v1, 0.0 }
 0x1f4   : > { %v1158_v5 = vpop.f32.mrf.mxu1 }
 0x1f5   : > { %v1224_v7 = vmax.f32 %v1155_v23, 0.0  ;;  %v1251_v24 = vpack.c.bf16 %v1223_v31, %v1221_v8  ;;  %v1159_v42 = vadd.f32 %v1158_v5, %v2766_v57 }
 0x1f6   : > { %v1160_v10 = vpop.f32.mrf.mxu1 }
 0x1f7   : > { %v1252_v11 = vpack.c.bf16 %v1224_v7, %v1222_v6  ;;  %v1161_v13 = vadd.f32 %v1160_v10, %v2762_v56  ;;  %v1225_v29 = vmax.f32 %v1159_v42, 0.0 }
 0x1f8   : > { %v1162_v12 = vpop.f32.mrf.mxu1 }
 0x1f9   : > { %v1163_v25 = vadd.f32 %v1162_v12, %v2766_v57  ;;  %1440 = vmatprep.mubr.bf16.mxu0 %v1252_v11  ;;  %v1226_v17 = vmax.f32 %v1161_v13, 0.0 }
 0x1fa   : > { %v1164_v14 = vpop.f32.mrf.mxu1  ;;  %1441 = vmatmul.mubr.bf16.gmra.mxu0 %v1251_v24 }
 0x1fb   : > { %v1165_v45 = vadd.f32 %v1164_v14, %v2762_v56  ;;  %v1227_v15 = vmax.f32 %v1163_v25, 0.0 }
 0x1fc   : > { %v1168_v40 = vpop.f32.mrf.mxu1 }
 0x1fd   : > { %v1228_v27 = vmax.f32 %v1165_v45, 0.0  ;;  %v1253_v26 = vpack.c.bf16 %v1227_v15, %v1225_v29  ;;  %v1169_v48 = vadd.f32 %v1168_v40, %v2766_v57 }
 0x1fe   : > { %v1170_v49 = vpop.f32.mrf.mxu1 }
 0x1ff   : > { %v1254_v16 = vpack.c.bf16 %v1228_v27, %v1226_v17  ;;  %v1171_v38 = vadd.f32 %v1170_v49, %v2762_v56  ;;  %v1229_v18 = vmax.f32 %v1169_v48, 0.0 }
 0x200   : > { %v1172_v30 = vpop.f32.mrf.mxu1 }
 0x201   : > { %v1173_v2 = vadd.f32 %v1172_v30, %v2766_v57  ;;  %1448 = vmatprep.mubr.bf16.mxu0 %v1254_v16  ;;  %v1230_v52 = vmax.f32 %v1171_v38, 0.0 }
 0x202   : > { %v1174_v32 = vpop.f32.mrf.mxu1  ;;  %1449 = vmatmul.mubr.bf16.gmra.mxu0 %v1253_v26 }
 0x203   : > { %v1175_v33 = vadd.f32 %v1174_v32, %v2762_v56  ;;  %v1231_v50 = vmax.f32 %v1173_v2, 0.0 }
 0x204   : > { %v1178_v51 = vpop.f32.mrf.mxu1 }
 0x205   : > { %v1232_v53 = vmax.f32 %v1175_v33, 0.0  ;;  %v1255_v62 = vpack.c.bf16 %v1231_v50, %v1229_v18  ;;  %v1179_v55 = vadd.f32 %v1178_v51, %v2766_v57 }
 0x206   : > { %v1180_v47 = vpop.f32.mrf.mxu1 }
 0x207   : > { %v1256_v46 = vpack.c.bf16 %v1232_v53, %v1230_v52  ;;  %v1181_v34 = vadd.f32 %v1180_v47, %v2762_v56  ;;  %v1233_v21 = vmax.f32 %v1179_v55, 0.0  ;;  %v2803_v52 = vld [vmem:[%s3027_s6] ss:$0 sm:$0xff] }
 0x208   : > { %v1182_v9 = vpop.f32.mrf.mxu1 }
 0x209   : > { %v1183_v19 = vadd.f32 %v1182_v9, %v2766_v57  ;;  %1456 = vmatprep.mubr.bf16.mxu0 %v1256_v46  ;;  %v1234_v20 = vmax.f32 %v1181_v34, 0.0 }
 0x20a   : > { %v1184_v54 = vpop.f32.mrf.mxu1  ;;  %1457 = vmatmul.mubr.bf16.gmra.mxu0 %v1255_v62 }
 0x20b   : > { %v1185_v58 = vadd.f32 %v1184_v54, %v2762_v56  ;;  %v1235_v28 = vmax.f32 %v1183_v19, 0.0 }
 0x20c   : > { %v1188_v60 = vpop.f32.mrf.mxu1 }
 0x20d   : > { %v1236_v61 = vmax.f32 %v1185_v58, 0.0  ;;  %v1257_v63 = vpack.c.bf16 %v1235_v28, %v1233_v21  ;;  %v1189_v3 = vadd.f32 %v1188_v60, %v2766_v57 }
 0x20e   : > { %v1190_v36 = vpop.f32.mrf.mxu1 }
 0x20f   : > { %v1258_v37 = vpack.c.bf16 %v1236_v61, %v1234_v20  ;;  %v1191_v43 = vadd.f32 %v1190_v36, %v2762_v56  ;;  %v1237_v22 = vmax.f32 %v1189_v3, 0.0 }
 0x210   : > { %v1192_v0 = vpop.f32.mrf.mxu1 }
 0x211   : > { %v1193_v35 = vadd.f32 %v1192_v0, %v2766_v57  ;;  %1464 = vmatprep.mubr.bf16.mxu0 %v1258_v37  ;;  %v1238_v1 = vmax.f32 %v1191_v43, 0.0 }
 0x212   : > { %v1194_v41 = vpop.f32.mrf.mxu1  ;;  %1465 = vmatmul.mubr.bf16.gmra.mxu0 %v1257_v63 }
 0x213   : > { %v1195_v44 = vadd.f32 %v1194_v41, %v2762_v56  ;;  %v1239_v4 = vmax.f32 %v1193_v35, 0.0 }
 0x214   : > { %v1198_v59 = vpop.f32.mrf.mxu1 }
 0x215   : > { %v1240_v39 = vmax.f32 %v1195_v44, 0.0  ;;  %v1259_v5 = vpack.c.bf16 %v1239_v4, %v1237_v22  ;;  %v1199_v10 = vadd.f32 %v1198_v59, %v2766_v57 }
 0x216   : > { %v1200_v23 = vpop.f32.mrf.mxu1 }
 0x217   : > { %v1260_v31 = vpack.c.bf16 %v1240_v39, %v1238_v1  ;;  %v1201_v7 = vadd.f32 %v1200_v23, %v2762_v56  ;;  %v1241_v14 = vmax.f32 %v1199_v10, 0.0 }
 0x218   : > { %v1202_v6 = vpop.f32.mrf.mxu1 }
 0x219   : > { %v1203_v8 = vadd.f32 %v1202_v6, %v2766_v57  ;;  %1472 = vmatprep.mubr.bf16.mxu1 %v1260_v31  ;;  %v1242_v25 = vmax.f32 %v1201_v7, 0.0 }
 0x21a   : > { %v1204_v11 = vpop.f32.mrf.mxu1  ;;  %1473 = vmatmul.mubr.bf16.vlgmr.msra.gmra.mxu1 %v1259_v5 }
 0x21b   : > { %v1205_v24 = vadd.f32 %v1204_v11, %v2762_v56  ;;  %v1243_v12 = vmax.f32 %v1203_v8, 0.0 }
 0x21c   : > { %v1208_v13 = vpop.f32.mrf.mxu1 }
 0x21d   : > { %v1244_v42 = vmax.f32 %v1205_v24, 0.0  ;;  %v1261_v40 = vpack.c.bf16 %v1243_v12, %v1241_v14  ;;  %v1209_v49 = vadd.f32 %v1208_v13, %v2766_v57 }
 0x21e   : > { %v1210_v45 = vpop.f32.mrf.mxu1 }
 0x21f   : > { %v1262_v15 = vpack.c.bf16 %v1244_v42, %v1242_v25  ;;  %v1211_v27 = vadd.f32 %v1210_v45, %v2762_v56  ;;  %v1245_v48 = vmax.f32 %v1209_v49, 0.0 }
 0x220   : > { %v1212_v17 = vpop.f32.mrf.mxu1 }
 0x221   : > { %v1213_v29 = vadd.f32 %v1212_v17, %v2766_v57  ;;  %1480 = vmatprep.mubr.bf16.mxu1 %v1262_v15  ;;  %v1246_v38 = vmax.f32 %v1211_v27, 0.0 }
 0x222   : > { %v1214_v16 = vpop.f32.mrf.mxu1  ;;  %1481 = vmatmul.mubr.bf16.gmra.mxu1 %v1261_v40 }
 0x223   : > { %v1215_v26 = vadd.f32 %v1214_v16, %v2762_v56  ;;  %v1247_v30 = vmax.f32 %v1213_v29, 0.0 }
 0x225   : > { %v1248_v2 = vmax.f32 %v1215_v26, 0.0  ;;  %v1263_v33 = vpack.c.bf16 %v1247_v30, %v1245_v48 }
 0x227   : > { %v1264_v32 = vpack.c.bf16 %v1248_v2, %v1246_v38 }
 0x229   : > { %1488 = vmatprep.mubr.bf16.mxu1 %v1264_v32 }
 0x22a   : > { %1489 = vmatmul.mubr.bf16.gmra.mxu1 %v1263_v33 }
 0x2b2   : > { %v1858_v50 = vpop.f32.mrf.mxu0 }
 0x2b4   : > { %v1859_v51 = vpop.f32.mrf.mxu0 }
 0x2b5   : > { %v1860_v57 = vadd.f32 %v1859_v51, %v1858_v50 }
 0x2b6   : > { %v1861_v53 = vpop.f32.mrf.mxu0 }
 0x2b7   : > { %v2806_v18 = vadd.f32 %v1860_v57, %v2803_v52 }
 0x2b8   : > { %v1862_v56 = vpop.f32.mrf.mxu0 }
 0x2b9   : > { %v1863_v47 = vadd.f32 %v1862_v56, %v1861_v53  ;;  %1497 = vmax.xlane.f32.xlu0 %v2806_v18 }
 0x2ba   : > { %v1864_v46 = vpop.f32.mrf.mxu0 }
 0x2bb   : > { %v2810_v62 = vadd.f32 %v1863_v47, %v2803_v52 }
 0x2bc   : > { %v1865_v9 = vpop.f32.mrf.mxu0 }
 0x2bd   : > { %v1866_v34 = vadd.f32 %v1865_v9, %v1864_v46  ;;  %1499 = vmax.xlane.f32.xlu0 %v2810_v62 }
 0x2be   : > { %v1867_v19 = vpop.f32.mrf.mxu0 }
 0x2bf   : > { %v2814_v55 = vadd.f32 %v1866_v34, %v2803_v52 }
 0x2c0   : > { %v1868_v54 = vpop.f32.mrf.mxu0 }
 0x2c1   : > { %v1869_v58 = vadd.f32 %v1868_v54, %v1867_v19  ;;  %1501 = vmax.xlane.f32.xlu1 %v2814_v55 }
 0x2c2   : > { %v1870_v28 = vpop.f32.mrf.mxu0 }
 0x2c3   : > { %v2818_v60 = vadd.f32 %v1869_v58, %v2803_v52 }
 0x2c4   : > { %v1871_v20 = vpop.f32.mrf.mxu0 }
 0x2c5   : > { %v1872_v61 = vadd.f32 %v1871_v20, %v1870_v28  ;;  %1503 = vmax.xlane.f32.xlu1 %v2818_v60 }
 0x2c6   : > { %v1873_v21 = vpop.f32.mrf.mxu0 }
 0x2c7   : > { %v2822_v36 = vadd.f32 %v1872_v61, %v2803_v52 }
 0x2c8   : > { %v1874_v37 = vpop.f32.mrf.mxu0 }
 0x2c9   : > { %v1875_v63 = vadd.f32 %v1874_v37, %v1873_v21  ;;  %1505 = vmax.xlane.f32.xlu0 %v2822_v36 }
 0x2ca   : > { %v1876_v0 = vpop.f32.mrf.mxu0 }
 0x2cb   : > { %v2826_v43 = vadd.f32 %v1875_v63, %v2803_v52 }
 0x2cc   : > { %v1877_v35 = vpop.f32.mrf.mxu0 }
 0x2cd   : > { %v1878_v3 = vadd.f32 %v1877_v35, %v1876_v0  ;;  %1507 = vmax.xlane.f32.xlu1 %v2826_v43 }
 0x2ce   : > { %v1879_v41 = vpop.f32.mrf.mxu0 }
 0x2cf   : > { %v2830_v44 = vadd.f32 %v1878_v3, %v2803_v52 }
 0x2d0   : > { %v1880_v4 = vpop.f32.mrf.mxu0 }
 0x2d1   : > { %v1881_v59 = vadd.f32 %v1880_v4, %v1879_v41  ;;  %1509 = vmax.xlane.f32.xlu0 %v2830_v44 }
 0x2d2   : > { %v1882_v1 = vpop.f32.mrf.mxu0 }
 0x2d3   : > { %v2834_v39 = vadd.f32 %v1881_v59, %v2803_v52 }
 0x2d4   : > { %v1883_v22 = vpop.f32.mrf.mxu0 }
 0x2d5   : > { %v1884_v23 = vadd.f32 %v1883_v22, %v1882_v1  ;;  %1511 = vmax.xlane.f32.xlu1 %v2834_v39 }
 0x2d6   : > { %v1885_v31 = vpop.f32.mrf.mxu0 }
 0x2d7   : > { %v2838_v5 = vadd.f32 %v1884_v23, %v2803_v52 }
 0x2d8   : > { %v1886_v6 = vpop.f32.mrf.mxu0 }
 0x2d9   : > { %v1887_v7 = vadd.f32 %v1886_v6, %v1885_v31  ;;  %1513 = vmax.xlane.f32.xlu0 %v2838_v5 }
 0x2da   : > { %v1888_v8 = vpop.f32.mrf.mxu1 }
 0x2db   : > { %v2842_v10 = vadd.f32 %v1887_v7, %v2803_v52 }
 0x2dc   : > { %v1889_v11 = vpop.f32.mrf.mxu1 }
 0x2dd   : > { %v1890_v24 = vadd.f32 %v1889_v11, %v1888_v8  ;;  %1515 = vmax.xlane.f32.xlu1 %v2842_v10 }
 0x2de   : > { %v1891_v12 = vpop.f32.mrf.mxu1 }
 0x2df   : > { %v2846_v13 = vadd.f32 %v1890_v24, %v2803_v52 }
 0x2e0   : > { %v1892_v25 = vpop.f32.mrf.mxu1 }
 0x2e1   : > { %v1893_v42 = vadd.f32 %v1892_v25, %v1891_v12  ;;  %1517 = vmax.xlane.f32.xlu0 %v2846_v13 }
 0x2e2   : > { %v1894_v14 = vpop.f32.mrf.mxu1 }
 0x2e3   : > { %v2850_v45 = vadd.f32 %v1893_v42, %v2803_v52 }
 0x2e4   : > { %v1895_v15 = vpop.f32.mrf.mxu1 }
 0x2e5   : > { %v1896_v40 = vadd.f32 %v1895_v15, %v1894_v14  ;;  %1519 = vmax.xlane.f32.xlu1 %v2850_v45 }
 0x2e6   : > { %v1897_v17 = vpop.f32.mrf.mxu1 }
 0x2e7   : > { %v2854_v27 = vadd.f32 %v1896_v40, %v2803_v52 }
 0x2e8   : > { %v1898_v29 = vpop.f32.mrf.mxu1 }
 0x2e9   : > { %v1899_v49 = vadd.f32 %v1898_v29, %v1897_v17  ;;  %1521 = vmax.xlane.f32.xlu0 %v2854_v27 }
 0x2ea   : > { %v1900_v16 = vpop.f32.mrf.mxu1 }
 0x2eb   : > { %v2858_v26 = vadd.f32 %v1899_v49, %v2803_v52 }
 0x2ec   : > { %v1901_v30 = vpop.f32.mrf.mxu1 }
 0x2ed   : > { %v1902_v38 = vadd.f32 %v1901_v30, %v1900_v16  ;;  %1523 = vmax.xlane.f32.xlu1 %v2858_v26 }
 0x2ee   : > { %v1903_v2 = vpop.f32.mrf.mxu1 }
 0x2ef   : > { %v2862_v48 = vadd.f32 %v1902_v38, %v2803_v52 }
 0x2f0   : > { %v1904_v32 = vpop.f32.mrf.mxu1 }
 0x2f1   : > { %v1905_v33 = vadd.f32 %v1904_v32, %v1903_v2  ;;  %1525 = vmax.xlane.f32.xlu0 %v2862_v48 }
 0x2f3   : > { %v2866_v50 = vadd.f32 %v1905_v33, %v2803_v52 }
 0x2f5   : > { %1527 = vmax.xlane.f32.xlu1 %v2866_v50 }
 0x342   : > { %v1498_v51 = vpop.xlane.xlu0 %1497 }
 0x343   : > { %v1529_v57 = vsub.f32 %v2806_v18, %v1498_v51 }
 0x345   : > { %v1545_v53 = vmul.f32 1.442695, %v1529_v57 }
 0x346   : > { %v1500_v56 = vpop.xlane.xlu0 %1499 }
 0x347   : > { %2086 = vpow2.f32 %v1545_v53  ;;  %v1530_v47 = vsub.f32 %v2810_v62, %v1500_v56 }
 0x349   : > { %v1547_v46 = vmul.f32 1.442695, %v1530_v47 }
 0x34a   : > { %v1502_v9 = vpop.xlane.xlu1 %1501 }
 0x34b   : > { %2088 = vpow2.f32 %v1547_v46  ;;  %v1531_v34 = vsub.f32 %v2814_v55, %v1502_v9 }
 0x34d   : > { %v1549_v19 = vmul.f32 1.442695, %v1531_v34 }
 0x34e   : > { %v1504_v54 = vpop.xlane.xlu1 %1503 }
 0x34f   : > { %2090 = vpow2.f32 %v1549_v19  ;;  %v1532_v52 = vsub.f32 %v2818_v60, %v1504_v54 }
 0x351   : > { %v1551_v58 = vmul.f32 1.442695, %v1532_v52 }
 0x352   : > { %v1506_v28 = vpop.xlane.xlu0 %1505 }
 0x353   : > { %2092 = vpow2.f32 %v1551_v58  ;;  %v1533_v18 = vsub.f32 %v2822_v36, %v1506_v28 }
 0x354   : > { %v2874_v20 = vpop.eup %2086 }
 0x355   : > { %v1553_v61 = vmul.f32 1.442695, %v1533_v18  ;;  %1577 = vadd.xlane.f32.xlu0 %v2874_v20 }
 0x356   : > { %v1508_v62 = vpop.xlane.xlu1 %1507 }
 0x357   : > { %2094 = vpow2.f32 %v1553_v61  ;;  %v1534_v21 = vsub.f32 %v2826_v43, %v1508_v62 }
 0x358   : > { %v2878_v55 = vpop.eup %2088 }
 0x359   : > { %v1555_v37 = vmul.f32 1.442695, %v1534_v21  ;;  %1579 = vadd.xlane.f32.xlu1 %v2878_v55 }
 0x35a   : > { %v1510_v60 = vpop.xlane.xlu0 %1509 }
 0x35b   : > { %2096 = vpow2.f32 %v1555_v37  ;;  %v1535_v63 = vsub.f32 %v2830_v44, %v1510_v60 }
 0x35c   : > { %v2882_v0 = vpop.eup %2090 }
 0x35d   : > { %v1557_v36 = vmul.f32 1.442695, %v1535_v63  ;;  %1581 = vadd.xlane.f32.xlu0 %v2882_v0 }
 0x35e   : > { %v1512_v35 = vpop.xlane.xlu1 %1511 }
 0x35f   : > { %2098 = vpow2.f32 %v1557_v36  ;;  %v1536_v3 = vsub.f32 %v2834_v39, %v1512_v35 }
 0x360   : > { %v2886_v41 = vpop.eup %2092 }
 0x361   : > { %v1559_v43 = vmul.f32 1.442695, %v1536_v3  ;;  %1583 = vadd.xlane.f32.xlu1 %v2886_v41 }
 0x362   : > { %v1514_v4 = vpop.xlane.xlu0 %1513 }
 0x363   : > { %2100 = vpow2.f32 %v1559_v43  ;;  %v1537_v59 = vsub.f32 %v2838_v5, %v1514_v4 }
 0x364   : > { %v2890_v1 = vpop.eup %2094 }
 0x365   : > { %v1561_v44 = vmul.f32 1.442695, %v1537_v59  ;;  %1585 = vadd.xlane.f32.xlu0 %v2890_v1 }
 0x366   : > { %v1516_v22 = vpop.xlane.xlu1 %1515 }
 0x367   : > { %2102 = vpow2.f32 %v1561_v44  ;;  %v1538_v23 = vsub.f32 %v2842_v10, %v1516_v22 }
 0x368   : > { %v2894_v31 = vpop.eup %2096 }
 0x369   : > { %v1563_v39 = vmul.f32 1.442695, %v1538_v23  ;;  %1587 = vadd.xlane.f32.xlu1 %v2894_v31 }
 0x36a   : > { %v1518_v6 = vpop.xlane.xlu0 %1517 }
 0x36b   : > { %2104 = vpow2.f32 %v1563_v39  ;;  %v1539_v7 = vsub.f32 %v2846_v13, %v1518_v6 }
 0x36c   : > { %v2898_v8 = vpop.eup %2098 }
 0x36d   : > { %v1565_v5 = vmul.f32 1.442695, %v1539_v7  ;;  %1589 = vadd.xlane.f32.xlu0 %v2898_v8 }
 0x36e   : > { %v1520_v11 = vpop.xlane.xlu1 %1519 }
 0x36f   : > { %2106 = vpow2.f32 %v1565_v5  ;;  %v1540_v24 = vsub.f32 %v2850_v45, %v1520_v11 }
 0x370   : > { %v2902_v12 = vpop.eup %2100 }
 0x371   : > { %v1567_v10 = vmul.f32 1.442695, %v1540_v24  ;;  %1591 = vadd.xlane.f32.xlu1 %v2902_v12 }
 0x372   : > { %v1522_v25 = vpop.xlane.xlu0 %1521 }
 0x373   : > { %2108 = vpow2.f32 %v1567_v10  ;;  %v1541_v42 = vsub.f32 %v2854_v27, %v1522_v25 }
 0x374   : > { %v2906_v14 = vpop.eup %2102 }
 0x375   : > { %v1569_v13 = vmul.f32 1.442695, %v1541_v42  ;;  %1593 = vadd.xlane.f32.xlu0 %v2906_v14 }
 0x376   : > { %v1524_v15 = vpop.xlane.xlu1 %1523 }
 0x377   : > { %2110 = vpow2.f32 %v1569_v13  ;;  %v1542_v40 = vsub.f32 %v2858_v26, %v1524_v15 }
 0x378   : > { %v2910_v17 = vpop.eup %2104 }
 0x379   : > { %v1571_v45 = vmul.f32 1.442695, %v1542_v40  ;;  %1595 = vadd.xlane.f32.xlu1 %v2910_v17 }
 0x37a   : > { %v1526_v29 = vpop.xlane.xlu0 %1525 }
 0x37b   : > { %2112 = vpow2.f32 %v1571_v45  ;;  %v1543_v49 = vsub.f32 %v2862_v48, %v1526_v29 }
 0x37c   : > { %v2914_v16 = vpop.eup %2106 }
 0x37d   : > { %v1573_v27 = vmul.f32 1.442695, %v1543_v49  ;;  %1597 = vadd.xlane.f32.xlu0 %v2914_v16 }
 0x37e   : > { %v1528_v30 = vpop.xlane.xlu1 %1527 }
 0x37f   : > { %2114 = vpow2.f32 %v1573_v27  ;;  %v1544_v38 = vsub.f32 %v2866_v50, %v1528_v30 }
 0x380   : > { %v2918_v2 = vpop.eup %2108 }
 0x381   : > { %v1575_v26 = vmul.f32 1.442695, %v1544_v38  ;;  %1599 = vadd.xlane.f32.xlu1 %v2918_v2 }
 0x383   : > { %2116 = vpow2.f32 %v1575_v26 }
 0x384   : > { %v2921_v32 = vpop.eup %2110 }
 0x385   : > { %1601 = vadd.xlane.f32.xlu0 %v2921_v32 }
 0x388   : > { %v2924_v48 = vpop.eup %2112 }
 0x389   : > { %1603 = vadd.xlane.f32.xlu1 %v2924_v48 }
 0x38c   : > { %v2927_v33 = vpop.eup %2114 }
 0x38d   : > { %1605 = vadd.xlane.f32.xlu0 %v2927_v33 }
 0x390   : > { %v2930_v50 = vpop.eup %2116 }
 0x391   : > { %1607 = vadd.xlane.f32.xlu1 %v2930_v50 }
 0x3de   : > { %v1578_v51 = vpop.xlane.xlu0 %1577 }
 0x3df   : > { %2118 = vrcp.f32 %v1578_v51 }
 0x3e2   : > { %v1580_v57 = vpop.xlane.xlu1 %1579 }
 0x3e3   : > { %2120 = vrcp.f32 %v1580_v57 }
 0x3e6   : > { %v1582_v53 = vpop.xlane.xlu0 %1581 }
 0x3e7   : > { %2122 = vrcp.f32 %v1582_v53 }
 0x3ea   : > { %v1584_v56 = vpop.xlane.xlu1 %1583 }
 0x3eb   : > { %2124 = vrcp.f32 %v1584_v56 }
 0x3ec   : > { %v2119_v47 = vpop.eup %2118 }
 0x3ed   : > { %v1610_v46 = vmul.f32 %v2119_v47, %v2874_v20 }
 0x3ee   : > { %v1586_v9 = vpop.xlane.xlu0 %1585 }
 0x3ef   : > { %1641 = vst [vmem:[%s2937_s22] sm:$0xff] %v1610_v46  ;;  %2126 = vrcp.f32 %v1586_v9 }
 0x3f0   : > { %v2121_v34 = vpop.eup %2120 }
 0x3f1   : > { %v1612_v19 = vmul.f32 %v2121_v34, %v2878_v55 }
 0x3f2   : > { %v1588_v54 = vpop.xlane.xlu1 %1587 }
 0x3f3   : > { %1642 = vst [vmem:[%s2937_s22 + $0x8] sm:$0xff] %v1612_v19  ;;  %2128 = vrcp.f32 %v1588_v54 }
 0x3f4   : > { %v2123_v52 = vpop.eup %2122 }
 0x3f5   : > { %v1614_v58 = vmul.f32 %v2123_v52, %v2882_v0 }
 0x3f6   : > { %v1590_v28 = vpop.xlane.xlu0 %1589 }
 0x3f7   : > { %1643 = vst [vmem:[%s2937_s22 + $0x10] sm:$0xff] %v1614_v58  ;;  %2130 = vrcp.f32 %v1590_v28 }
 0x3f8   : > { %v2125_v18 = vpop.eup %2124 }
 0x3f9   : > { %v1616_v20 = vmul.f32 %v2125_v18, %v2886_v41 }
 0x3fa   : > { %v1592_v61 = vpop.xlane.xlu1 %1591 }
 0x3fb   : > { %1644 = vst [vmem:[%s2937_s22 + $0x18] sm:$0xff] %v1616_v20  ;;  %2132 = vrcp.f32 %v1592_v61 }
 0x3fc   : > { %v2127_v62 = vpop.eup %2126 }
 0x3fd   : > { %v1618_v21 = vmul.f32 %v2127_v62, %v2890_v1 }
 0x3fe   : > { %v1594_v55 = vpop.xlane.xlu0 %1593 }
 0x3ff   : > { %1645 = vst [vmem:[%s2937_s22 + $0x20] sm:$0xff] %v1618_v21  ;;  %2134 = vrcp.f32 %v1594_v55 }
 0x400   : > { %v2129_v37 = vpop.eup %2128 }
 0x401   : > { %v1620_v60 = vmul.f32 %v2129_v37, %v2894_v31 }
 0x402   : > { %v1596_v63 = vpop.xlane.xlu1 %1595 }
 0x403   : > { %1646 = vst [vmem:[%s2937_s22 + $0x28] sm:$0xff] %v1620_v60  ;;  %2136 = vrcp.f32 %v1596_v63 }
 0x404   : > { %v2131_v0 = vpop.eup %2130 }
 0x405   : > { %v1622_v36 = vmul.f32 %v2131_v0, %v2898_v8 }
 0x406   : > { %v1598_v35 = vpop.xlane.xlu0 %1597 }
 0x407   : > { %1647 = vst [vmem:[%s2937_s22 + $0x30] sm:$0xff] %v1622_v36  ;;  %2138 = vrcp.f32 %v1598_v35 }
 0x408   : > { %v2133_v3 = vpop.eup %2132 }
 0x409   : > { %v1624_v41 = vmul.f32 %v2133_v3, %v2902_v12 }
 0x40a   : > { %v1600_v43 = vpop.xlane.xlu1 %1599 }
 0x40b   : > { %1648 = vst [vmem:[%s2937_s22 + $0x38] sm:$0xff] %v1624_v41  ;;  %2140 = vrcp.f32 %v1600_v43 }
 0x40c   : > { %v2135_v4 = vpop.eup %2134 }
 0x40d   : > { %v1626_v59 = vmul.f32 %v2135_v4, %v2906_v14 }
 0x40e   : > { %v1602_v1 = vpop.xlane.xlu0 %1601 }
 0x40f   : > { %1649 = vst [vmem:[%s2937_s22 + $0x40] sm:$0xff] %v1626_v59  ;;  %2142 = vrcp.f32 %v1602_v1 }
 0x410   : > { %v2137_v44 = vpop.eup %2136 }
 0x411   : > { %v1628_v22 = vmul.f32 %v2137_v44, %v2910_v17 }
 0x412   : > { %v1604_v23 = vpop.xlane.xlu1 %1603 }
 0x413   : > { %1650 = vst [vmem:[%s2937_s22 + $0x48] sm:$0xff] %v1628_v22  ;;  %2144 = vrcp.f32 %v1604_v23 }
 0x414   : > { %v2139_v31 = vpop.eup %2138 }
 0x415   : > { %v1630_v39 = vmul.f32 %v2139_v31, %v2914_v16 }
 0x416   : > { %v1606_v6 = vpop.xlane.xlu0 %1605 }
 0x417   : > { %1651 = vst [vmem:[%s2937_s22 + $0x50] sm:$0xff] %v1630_v39  ;;  %2146 = vrcp.f32 %v1606_v6 }
 0x418   : > { %v2141_v7 = vpop.eup %2140 }
 0x419   : > { %v1632_v8 = vmul.f32 %v2141_v7, %v2918_v2 }
 0x41a   : > { %v1608_v5 = vpop.xlane.xlu1 %1607 }
 0x41b   : > { %1652 = vst [vmem:[%s2937_s22 + $0x58] sm:$0xff] %v1632_v8  ;;  %2148 = vrcp.f32 %v1608_v5 }
 0x41c   : > { %v2143_v11 = vpop.eup %2142 }
 0x41d   : > { %v1634_v24 = vmul.f32 %v2143_v11, %v2921_v32 }
 0x41f   : > { %1653 = vst [vmem:[%s2937_s22 + $0x60] sm:$0xff] %v1634_v24 }
 0x420   : > { %v2145_v12 = vpop.eup %2144 }
 0x421   : > { %v1636_v10 = vmul.f32 %v2145_v12, %v2924_v48 }
 0x423   : > { %1654 = vst [vmem:[%s2937_s22 + $0x68] sm:$0xff] %v1636_v10 }
 0x424   : > { %v2147_v25 = vpop.eup %2146 }
 0x425   : > { %v1638_v42 = vmul.f32 %v2147_v25, %v2927_v33 }
 0x427   : > { %1655 = vst [vmem:[%s2937_s22 + $0x70] sm:$0xff] %v1638_v42 }
 0x428   : > { %v2149_v14 = vpop.eup %2148 }
 0x429   : > { %v1640_v13 = vmul.f32 %v2149_v14, %v2930_v50 }
 0x42b   : > { %1656 = vst [vmem:[%s2937_s22 + $0x78] sm:$0xff] %v1640_v13 }
 0x42c   : > { %2163 = shalt.err (!%p2160_p3)
}
 0x42d   : > { %s2164_s20 = scalar_lea.hbm %s2973_s16, 2048  ;;  %s2168_s8 = scalar_lea.hbm %s3028_s7, 4096 }
 0x42e   : > { %p2165_p4 = scmp.ne.s32.totalorder %s2973_s16, %s2164_s20  ;;  %p2169_p9 = scmp.lt.s32.totalorder %s2973_s16, %s3028_s7 }
 0x42f   : > { %p2170_p10 = scmp.lt.s32.totalorder %s2168_s8, %s2164_s20 }
 0x430   : > { %p2166_p7 = pnand %p2165_p4, %p2294_p5 }
 0x431   : > { %p2171_p11 = por %p2170_p10, %p2169_p9 }
 0x432   : > { %p2167_p8 = pneg %p2166_p7 }
 0x434   : > { %p2172_p12 = pnand %p2171_p11, %p2167_p8 }
 0x436   : > { %2175 = shalt.err (!%p2172_p12)
}
 0x437   : > { %s2214_s14 = smov 128   ;;  %s2215_s15 = smov 8  }
 0x438   : > { %1923 = dma.vmem_to_hbm [thread:$0]  (%p2294_p5), %s2975_s9, 2048, %s2973_s16, %s2981_s17, %s2214_s14, %s2214_s14, %s2215_s15  }
 0x439 PF: > { %p1929_p13 = scmp.ge.s32.totalorder %s2210_s27, 2  ;;  %s1686_s28 = sand.u32 1, %s2198_s24  }
 0x43a   : > { %s1687_s13 = scalar_lea.sflag [#allocation3], %s1686_s28 }
 0x43b   : > { %p1926_p0 = pnand %p1929_p13, %p2298_p6 }
 0x43d   : > { %p1927_p1 = pneg %p1926_p0 }
 0x43f   : > { %2193 = dma.done.wait (%p1927_p1), %s1687_s13, 2048  }
 0x440   : > { %2195 = vsyncadd (%p1927_p1), %s1687_s13, 4294965248  ;;  %p17_p2 = scmp.ge.s32.totalorder %s2281_s30, 4   ;;  %s3031_s24 = smov %s2202_s25 }
 0x441   : > { %s3032_s25 = smov %s2206_s26  ;;  %s3033_s26 = smov %s2292_s10 }
 0x442   : > { %s3034_s27 = smov %s2281_s30  ;;  %19 = sbr.rel (!%p17_p2) target bundleno = 3 (0x3), region = 83 }
 0x447   :  { %1692 = vsyncpa [#allocation3], 1 }
 0x448   :  { %1694 = vsyncpa [#allocation3 + $0x1], 1 }

</bundles_post_ra>
